<compile_context>
chip_gen: v7x
topology: tpu7x:2x2x1
jax: 0.10.0
libtpu: 0.0.40
codegen_flags: <defaults>
</compile_context>

<pallas_src>
import functools
import math

import numpy as np
import jax
import jax.numpy as jnp
from jax.experimental import pallas as pl
from jax.experimental.pallas import tpu as pltpu

LN_EPS = 1e-6


# ---------------------------------------------------------------------------
# timing signal (same as _gen_timing_signal in the PyTorch code)
# ---------------------------------------------------------------------------
def gen_timing_signal(length, channels, min_timescale=1.0, max_timescale=1.0e4):
    position = np.arange(length, dtype=np.float64)
    num_timescales = channels // 2
    log_timescale_increment = math.log(float(max_timescale) / float(min_timescale)) / max(
        float(num_timescales) - 1.0, 1.0
    )
    inv_timescales = min_timescale * np.exp(
        np.arange(num_timescales, dtype=np.float64) * -log_timescale_increment
    )
    scaled_time = position[:, None] * inv_timescales[None, :]
    signal = np.concatenate([np.sin(scaled_time), np.cos(scaled_time)], axis=1)
    signal = np.pad(signal, [[0, 0], [0, channels % 2]], mode="constant")
    return jnp.asarray(signal, dtype=jnp.float32)  # (length, channels)


# ---------------------------------------------------------------------------
# in-kernel helpers
# ---------------------------------------------------------------------------
def _layernorm(x, g, b):
    # torch-style custom LayerNorm: mean/std over last dim, std is unbiased (ddof=1),
    # eps added to std (not variance).
    mean = jnp.mean(x, axis=-1, keepdims=True)
    d = x - mean
    var = jnp.sum(d * d, axis=-1, keepdims=True) / (x.shape[-1] - 1)
    std = jnp.sqrt(var)
    return g * d / (std + LN_EPS) + b


# ---------------------------------------------------------------------------
# fused Pallas kernel: projection + timing + all encoder layers + final LN
# ---------------------------------------------------------------------------
def fused_encoder_kernel(
    x_ref,            # (BS, E)   flattened (batch*seq, emb) inputs
    ts_ref,           # (BS, H)   timing signal tiled per batch
    bias_ref,         # (BS, BS)  additive attention bias (0 / -1e18, block-diag + pad mask)
    sprev_ref,        # (BS, BS)  shift matrix: row t picks row t-1 (0 at sequence starts)
    snext_ref,        # (BS, BS)  shift matrix: row t picks row t+1 (0 at sequence ends)
    wp_ref,           # (E, H)    embedding projection (pre-transposed)
    ln1g_ref, ln1b_ref,   # (NL, 1, H)
    wqkv_ref,         # (NL, H, KD+KD+VD)  merged Q|K|V projection
    wo_ref,           # (NL, VD, H)
    ln2g_ref, ln2b_ref,   # (NL, 1, H)
    w1_ref,           # (NL, 3H, F)   conv1 taps stacked along rows
    b1_ref,           # (NL, 1, F)
    w2_ref,           # (NL, 3F, H)   conv2 taps stacked along rows
    b2_ref,           # (NL, 1, H)
    lnfg_ref, lnfb_ref,   # (1, H)
    o_ref,            # (BS, H)
    *, num_layers, num_heads, key_depth, value_depth,
):
    # --- embedding projection + timing signal ---
    x = jnp.dot(x_ref[...], wp_ref[...], preferred_element_type=jnp.float32) + ts_ref[...]
    BS, H = x.shape
    dk = key_depth // num_heads
    dv = value_depth // num_heads
    scale = jnp.float32(dk) ** -0.5

    bias = bias_ref[...]       # hoisted once for all layers / heads
    sprev = sprev_ref[...]
    snext = snext_ref[...]

    for l in range(num_layers):  # static unroll over layers; x stays resident
        # ---- multi-head self-attention sublayer (pre-LN) ----
        xn = _layernorm(x, ln1g_ref[l], ln1b_ref[l])
        qkv = jnp.dot(xn, wqkv_ref[l], preferred_element_type=jnp.float32)   # (BS, 2KD+VD)
        q = qkv[:, :key_depth] * scale
        k = qkv[:, key_depth:2 * key_depth]
        v = qkv[:, 2 * key_depth:]
        wo = wo_ref[l]                                                       # (VD, H)

        attn = jnp.zeros((BS, H), jnp.float32)
        for h in range(num_heads):   # static unroll over heads
            qh = q[:, h * dk:(h + 1) * dk]
            kh = k[:, h * dk:(h + 1) * dk]
            vh = v[:, h * dv:(h + 1) * dv]
            logits = jax.lax.dot_general(
                qh, kh, (((1,), (1,)), ((), ())), preferred_element_type=jnp.float32
            ) + bias                                                         # (BS, BS)
            w = jax.nn.softmax(logits, axis=-1)
            ctx = jnp.dot(w, vh, preferred_element_type=jnp.float32)         # (BS, dv)
            attn = attn + jnp.dot(ctx, wo[h * dv:(h + 1) * dv, :],
                                  preferred_element_type=jnp.float32)
        x = x + attn                                                         # residual

        # ---- position-wise FFN: Conv1d(k=3,'both') -> ReLU -> Conv1d(k=3,'both') ----
        xn2 = _layernorm(x, ln2g_ref[l], ln2b_ref[l])
        x_prev = jnp.dot(sprev, xn2, preferred_element_type=jnp.float32)     # x[t-1] (0 at starts)
        x_next = jnp.dot(snext, xn2, preferred_element_type=jnp.float32)     # x[t+1] (0 at ends)
        x_cat = jnp.concatenate([x_prev, xn2, x_next], axis=-1)              # (BS, 3H)
        h1 = jax.nn.relu(
            jnp.dot(x_cat, w1_ref[l], preferred_element_type=jnp.float32) + b1_ref[l]
        )                                                                    # (BS, F)

        h_prev = jnp.dot(sprev, h1, preferred_element_type=jnp.float32)
        h_next = jnp.dot(snext, h1, preferred_element_type=jnp.float32)
        h_cat = jnp.concatenate([h_prev, h1, h_next], axis=-1)               # (BS, 3F)
        y = jnp.dot(h_cat, w2_ref[l], preferred_element_type=jnp.float32) + b2_ref[l]
        x = x + y                                                            # residual

    # ---- final layer norm, single lane-contiguous store ----
    o_ref[...] = _layernorm(x, lnfg_ref[...], lnfb_ref[...])


# ---------------------------------------------------------------------------
# wrapper: full Emotion_Encoder forward (one pallas_call)
# ---------------------------------------------------------------------------
def emotion_encoder_forward(inputs, mask_f, params, *, num_heads, key_depth, value_depth):
    B, S, E = inputs.shape
    H = params["wp"].shape[1]
    layers = params["layers"]
    NL = len(layers)
    F_ = layers[0]["w1"].shape[-1]
    KD, VD = key_depth, value_depth
    BS = B * S

    # flatten batch into rows
    x2d = inputs.reshape(BS, E)
    timing = jnp.tile(params["timing"][:S], (B, 1))                         # (BS, H)

    # block-diagonal additive attention bias: -1e18 for cross-batch or padded keys
    idx = jnp.arange(BS)
    bi = idx // S                                                            # batch id per row
    key_pad = mask_f.reshape(BS) > 0.5                                       # True = PAD key
    valid = (bi[:, None] == bi[None, :]) & (~key_pad)[None, :]
    bias = jnp.where(valid, 0.0, -1e18).astype(jnp.float32)                  # (BS, BS)

    # sequence shift matrices (zero across sequence/batch boundaries) for the k=3 convs
    sprev = ((idx[:, None] - 1 == idx[None, :]) &
             ((idx % S) != 0)[:, None]).astype(jnp.float32)                  # picks x[t-1]
    snext = ((idx[:, None] + 1 == idx[None, :]) &
             ((idx % S) != S - 1)[:, None]).astype(jnp.float32)              # picks x[t+1]

    # stacked / pre-merged per-layer weights (all tiny; live in VMEM for the whole forward)
    ln1g = jnp.stack([lp["ln1_g"] for lp in layers])                         # (NL, 1, H)
    ln1b = jnp.stack([lp["ln1_b"] for lp in layers])
    wqkv = jnp.stack([jnp.concatenate([lp["wq"], lp["wk"], lp["wv"]], axis=1)
                      for lp in layers])                                     # (NL, H, 2KD+VD)
    wo = jnp.stack([lp["wo"] for lp in layers])                              # (NL, VD, H)
    ln2g = jnp.stack([lp["ln2_g"] for lp in layers])
    ln2b = jnp.stack([lp["ln2_b"] for lp in layers])
    w1c = jnp.stack([lp["w1"].reshape(3 * H, F_) for lp in layers])          # (NL, 3H, F)
    b1s = jnp.stack([lp["b1"] for lp in layers])                             # (NL, 1, F)
    w2c = jnp.stack([lp["w2"].reshape(3 * F_, H) for lp in layers])          # (NL, 3F, H)
    b2s = jnp.stack([lp["b2"] for lp in layers])                             # (NL, 1, H)

    def full(shape):
        nd = len(shape)
        return pl.BlockSpec(shape, lambda i, nd=nd: (0,) * nd)

    kern = functools.partial(
        fused_encoder_kernel,
        num_layers=NL, num_heads=num_heads, key_depth=KD, value_depth=VD,
    )

    out2d = pl.pallas_call(
        kern,
        out_shape=jax.ShapeDtypeStruct((BS, H), jnp.float32),
        grid=(1,),
        in_specs=[
            full((BS, E)), full((BS, H)), full((BS, BS)), full((BS, BS)), full((BS, BS)),
            full((E, H)),
            full((NL, 1, H)), full((NL, 1, H)),
            full((NL, H, 2 * KD + VD)), full((NL, VD, H)),
            full((NL, 1, H)), full((NL, 1, H)),
            full((NL, 3 * H, F_)), full((NL, 1, F_)),
            full((NL, 3 * F_, H)), full((NL, 1, H)),
            full((1, H)), full((1, H)),
        ],
        out_specs=full((BS, H)),
        compiler_params=pltpu.CompilerParams(dimension_semantics=("arbitrary",)),
    )(
        x2d, timing, bias, sprev, snext,
        params["wp"],
        ln1g, ln1b, wqkv, wo, ln2g, ln2b, w1c, b1s, w2c, b2s,
        params["lnf_g"], params["lnf_b"],
    )
    return out2d.reshape(B, S, H)


# ---------------------------------------------------------------------------
# deterministic parameter init (weights stored pre-transposed to (in, out))
# ---------------------------------------------------------------------------
def init_params(key, E, H, KD, VD, F_, num_layers, max_length=1000):
    keys = jax.random.split(key, 2 + num_layers)

    def lin(k, shape, scale=0.08):
        return (scale * jax.random.normal(k, shape)).astype(jnp.float32)

    params = {
        "wp": lin(keys[0], (E, H)),                  # embedding_proj.weight^T
        "timing": gen_timing_signal(max_length, H),  # (max_length, H)
    }
    kf = jax.random.split(keys[1], 2)
    params["lnf_g"] = (1.0 + 0.1 * jax.random.normal(kf[0], (1, H))).astype(jnp.float32)
    params["lnf_b"] = (0.1 * jax.random.normal(kf[1], (1, H))).astype(jnp.float32)

    layers = []
    for l in range(num_layers):
        lk = jax.random.split(keys[2 + l], 12)
        layers.append(dict(
            ln1_g=(1.0 + 0.1 * jax.random.normal(lk[0], (1, H))).astype(jnp.float32),
            ln1_b=(0.1 * jax.random.normal(lk[1], (1, H))).astype(jnp.float32),
            wq=lin(lk[2], (H, KD)),
            wk=lin(lk[3], (H, KD)),
            wv=lin(lk[4], (H, VD)),
            wo=lin(lk[5], (VD, H)),
            ln2_g=(1.0 + 0.1 * jax.random.normal(lk[6], (1, H))).astype(jnp.float32),
            ln2_b=(0.1 * jax.random.normal(lk[7], (1, H))).astype(jnp.float32),
            # Conv1d weights stored as (kernel_tap, in_channels, out_channels)
            w1=lin(lk[8], (3, H, F_)),
            b1=lin(lk[9], (1, F_)),
            w2=lin(lk[10], (3, F_, H)),
            b2=lin(lk[11], (1, H)),
        ))
    params["layers"] = layers
    return params


# ---------------------------------------------------------------------------
# pure-JAX reference (mirror of the PyTorch forward) for correctness check
# ---------------------------------------------------------------------------
def _ref_ln(x, g, b):
    mean = jnp.mean(x, axis=-1, keepdims=True)
    d = x - mean
    var = jnp.sum(d * d, axis=-1, keepdims=True) / (x.shape[-1] - 1)
    return g * d / (jnp.sqrt(var) + LN_EPS) + b


def reference_forward(inputs, mask_bool, params, *, num_heads, key_depth, value_depth):
    B, S, E = inputs.shape
    dk = key_depth // num_heads
    dv = value_depth // num_heads
    x = jnp.einsum("bse,eh->bsh", inputs, params["wp"]) + params["timing"][:S][None]
    for lp in params["layers"]:
        xn = _ref_ln(x, lp["ln1_g"], lp["ln1_b"])
        q = jnp.einsum("bsh,hk->bsk", xn, lp["wq"])
        k = jnp.einsum("bsh,hk->bsk", xn, lp["wk"])
        v = jnp.einsum("bsh,hk->bsk", xn, lp["wv"])
        ctxs = []
        for h in range(num_heads):
            qh = q[..., h * dk:(h + 1) * dk] * dk ** -0.5
            kh = k[..., h * dk:(h + 1) * dk]
            vh = v[..., h * dv:(h + 1) * dv]
            logits = jnp.einsum("bqd,bkd->bqk", qh, kh)
            logits = jnp.where(mask_bool, -1e18, logits)   # mask (B,1,S) broadcasts over queries
            w = jax.nn.softmax(logits, axis=-1)
            ctxs.append(jnp.einsum("bqk,bkd->bqd", w, vh))
        ctx = jnp.concatenate(ctxs, axis=-1)
        x = x + jnp.einsum("bsv,vh->bsh", ctx, lp["wo"])

        xn2 = _ref_ln(x, lp["ln2_g"], lp["ln2_b"])
        xp = jnp.pad(xn2, ((0, 0), (1, 1), (0, 0)))
        h1 = sum(jnp.einsum("bsh,hf->bsf", xp[:, kk:kk + S], lp["w1"][kk]) for kk in range(3))
        h1 = jax.nn.relu(h1 + lp["b1"])
        hp = jnp.pad(h1, ((0, 0), (1, 1), (0, 0)))
        y = sum(jnp.einsum("bsf,fh->bsh", hp[:, kk:kk + S], lp["w2"][kk]) for kk in range(3))
        x = x + y + lp["b2"]
    return _ref_ln(x, params["lnf_g"], params["lnf_b"])


# ---------------------------------------------------------------------------
if __name__ == "__main__":
    # small config consistent with the module: embedding=32, hidden=32, layers=2,
    # heads=2, key/value depth=16, filter=64
    B, S, E, H = 2, 8, 32, 32
    NH, KD, VD, F_, NL = 2, 16, 16, 64, 2

    root = jax.random.PRNGKey(0)
    k_in, k_par = jax.random.split(root)

    inputs = jax.random.normal(k_in, (B, S, E), dtype=jnp.float32)
    # padding mask: True where position is PAD (as produced by .eq(PAD_idx).unsqueeze(1))
    lengths = jnp.array([S, S - 2])
    mask_bool = (jnp.arange(S)[None, :] >= lengths[:, None])[:, None, :]   # (B, 1, S)
    mask_f = mask_bool.astype(jnp.float32)

    params = init_params(k_par, E, H, KD, VD, F_, NL)

    out = emotion_encoder_forward(
        inputs, mask_f, params, num_heads=NH, key_depth=KD, value_depth=VD
    )
    out = jax.block_until_ready(out)

    ref = reference_forward(
        inputs, mask_bool, params, num_heads=NH, key_depth=KD, value_depth=VD
    )
    ref = jax.block_until_ready(ref)

    assert out.shape == (B, S, H)
    assert bool(jnp.all(jnp.isfinite(out)))
    np.testing.assert_allclose(np.asarray(out), np.asarray(ref), rtol=2e-2, atol=2e-2)

    print("KERNEL_OK")
</pallas_src>

<mosaic_0001>
module attributes {stable_mosaic.version = 11 : i64} {
  func.func @fused_encoder_kernel(%arg0: i32, %arg1: memref<16x32xf32, #tpu.memory_space<vmem>>, %arg2: memref<16x32xf32, #tpu.memory_space<vmem>>, %arg3: memref<16x16xf32, #tpu.memory_space<vmem>>, %arg4: memref<16x16xf32, #tpu.memory_space<vmem>>, %arg5: memref<16x16xf32, #tpu.memory_space<vmem>>, %arg6: memref<32x32xf32, #tpu.memory_space<vmem>>, %arg7: memref<2x1x32xf32, #tpu.memory_space<vmem>>, %arg8: memref<2x1x32xf32, #tpu.memory_space<vmem>>, %arg9: memref<2x32x48xf32, #tpu.memory_space<vmem>>, %arg10: memref<2x16x32xf32, #tpu.memory_space<vmem>>, %arg11: memref<2x1x32xf32, #tpu.memory_space<vmem>>, %arg12: memref<2x1x32xf32, #tpu.memory_space<vmem>>, %arg13: memref<2x96x64xf32, #tpu.memory_space<vmem>>, %arg14: memref<2x1x64xf32, #tpu.memory_space<vmem>>, %arg15: memref<2x192x32xf32, #tpu.memory_space<vmem>>, %arg16: memref<2x1x32xf32, #tpu.memory_space<vmem>>, %arg17: memref<1x32xf32, #tpu.memory_space<vmem>>, %arg18: memref<1x32xf32, #tpu.memory_space<vmem>>, %arg19: memref<16x32xf32, #tpu.memory_space<vmem>>) attributes {dimension_semantics = [#tpu.dimension_semantics<arbitrary>], iteration_bounds = array<i64: 1>, scalar_prefetch = 0 : i64, scratch_operands = 0 : i64, tpu.core_type = #tpu.core_type<tc>, window_params = [{pipeline_mode = #tpu.pipeline_mode<synchronous>, transform_indices = @transform_0, window_bounds = array<i64: 16, 32>}, {pipeline_mode = #tpu.pipeline_mode<synchronous>, transform_indices = @transform_1, window_bounds = array<i64: 16, 32>}, {pipeline_mode = #tpu.pipeline_mode<synchronous>, transform_indices = @transform_2, window_bounds = array<i64: 16, 16>}, {pipeline_mode = #tpu.pipeline_mode<synchronous>, transform_indices = @transform_3, window_bounds = array<i64: 16, 16>}, {pipeline_mode = #tpu.pipeline_mode<synchronous>, transform_indices = @transform_4, window_bounds = array<i64: 16, 16>}, {pipeline_mode = #tpu.pipeline_mode<synchronous>, transform_indices = @transform_5, window_bounds = array<i64: 32, 32>}, {pipeline_mode = #tpu.pipeline_mode<synchronous>, transform_indices = @transform_6, window_bounds = array<i64: 2, 1, 32>}, {pipeline_mode = #tpu.pipeline_mode<synchronous>, transform_indices = @transform_7, window_bounds = array<i64: 2, 1, 32>}, {pipeline_mode = #tpu.pipeline_mode<synchronous>, transform_indices = @transform_8, window_bounds = array<i64: 2, 32, 48>}, {pipeline_mode = #tpu.pipeline_mode<synchronous>, transform_indices = @transform_9, window_bounds = array<i64: 2, 16, 32>}, {pipeline_mode = #tpu.pipeline_mode<synchronous>, transform_indices = @transform_10, window_bounds = array<i64: 2, 1, 32>}, {pipeline_mode = #tpu.pipeline_mode<synchronous>, transform_indices = @transform_11, window_bounds = array<i64: 2, 1, 32>}, {pipeline_mode = #tpu.pipeline_mode<synchronous>, transform_indices = @transform_12, window_bounds = array<i64: 2, 96, 64>}, {pipeline_mode = #tpu.pipeline_mode<synchronous>, transform_indices = @transform_13, window_bounds = array<i64: 2, 1, 64>}, {pipeline_mode = #tpu.pipeline_mode<synchronous>, transform_indices = @transform_14, window_bounds = array<i64: 2, 192, 32>}, {pipeline_mode = #tpu.pipeline_mode<synchronous>, transform_indices = @transform_15, window_bounds = array<i64: 2, 1, 32>}, {pipeline_mode = #tpu.pipeline_mode<synchronous>, transform_indices = @transform_16, window_bounds = array<i64: 1, 32>}, {pipeline_mode = #tpu.pipeline_mode<synchronous>, transform_indices = @transform_17, window_bounds = array<i64: 1, 32>}, {pipeline_mode = #tpu.pipeline_mode<synchronous>, transform_indices = @transform_18, window_bounds = array<i64: 16, 32>}]} {
    %c0 = arith.constant 0 : index
    %c0_0 = arith.constant 0 : index
    %0 = vector.load %arg1[%c0, %c0_0] : memref<16x32xf32, #tpu.memory_space<vmem>>, vector<16x32xf32>
    %c0_1 = arith.constant 0 : index
    %c0_2 = arith.constant 0 : index
    %1 = vector.load %arg6[%c0_1, %c0_2] : memref<32x32xf32, #tpu.memory_space<vmem>>, vector<32x32xf32>
    %cst = arith.constant dense<0.000000e+00> : vector<16x32xf32>
    %2 = tpu.matmul %0, %1, %cst {dimension_numbers = #tpu.dot_dimension_numbers<[1], [0], [0], [1], [0, 0, 1, 1], [], []>} : vector<16x32xf32>, vector<32x32xf32>, vector<16x32xf32> -> vector<16x32xf32>
    %c0_3 = arith.constant 0 : index
    %c0_4 = arith.constant 0 : index
    %3 = vector.load %arg2[%c0_3, %c0_4] : memref<16x32xf32, #tpu.memory_space<vmem>>, vector<16x32xf32>
    %4 = arith.addf %2, %3 : vector<16x32xf32>
    %cst_5 = arith.constant 8.000000e+00 : f32
    %cst_6 = arith.constant -5.000000e-01 : f32
    %5 = math.powf %cst_5, %cst_6 : f32
    %c0_7 = arith.constant 0 : index
    %c0_8 = arith.constant 0 : index
    %6 = vector.load %arg3[%c0_7, %c0_8] : memref<16x16xf32, #tpu.memory_space<vmem>>, vector<16x16xf32>
    %c0_9 = arith.constant 0 : index
    %c0_10 = arith.constant 0 : index
    %7 = vector.load %arg4[%c0_9, %c0_10] : memref<16x16xf32, #tpu.memory_space<vmem>>, vector<16x16xf32>
    %c0_11 = arith.constant 0 : index
    %c0_12 = arith.constant 0 : index
    %8 = vector.load %arg5[%c0_11, %c0_12] : memref<16x16xf32, #tpu.memory_space<vmem>>, vector<16x16xf32>
    %c0_13 = arith.constant 0 : index
    %c0_14 = arith.constant 0 : index
    %c0_15 = arith.constant 0 : index
    %9 = vector.load %arg7[%c0_13, %c0_14, %c0_15] : memref<2x1x32xf32, #tpu.memory_space<vmem>>, vector<1x1x32xf32>
    %10 = vector.shape_cast %9 : vector<1x1x32xf32> to vector<1x32xf32>
    %c0_16 = arith.constant 0 : index
    %c0_17 = arith.constant 0 : index
    %c0_18 = arith.constant 0 : index
    %11 = vector.load %arg8[%c0_16, %c0_17, %c0_18] : memref<2x1x32xf32, #tpu.memory_space<vmem>>, vector<1x1x32xf32>
    %12 = vector.shape_cast %11 : vector<1x1x32xf32> to vector<1x32xf32>
    %cst_19 = arith.constant dense<0.000000e+00> : vector<16xf32>
    %13 = vector.multi_reduction <add>, %4, %cst_19 [1] : vector<16x32xf32> to vector<16xf32>
    %14 = vector.shape_cast %13 : vector<16xf32> to vector<16x1xf32>
    %cst_20 = arith.constant 3.200000e+01 : f32
    %15 = vector.broadcast %cst_20 : f32 to vector<16x1xf32>
    %16 = arith.divf %14, %15 : vector<16x1xf32>
    %17 = vector.broadcast %16 : vector<16x1xf32> to vector<16x32xf32>
    %18 = arith.subf %4, %17 : vector<16x32xf32>
    %19 = arith.mulf %18, %18 : vector<16x32xf32>
    %cst_21 = arith.constant dense<0.000000e+00> : vector<16xf32>
    %20 = vector.multi_reduction <add>, %19, %cst_21 [1] : vector<16x32xf32> to vector<16xf32>
    %21 = vector.shape_cast %20 : vector<16xf32> to vector<16x1xf32>
    %cst_22 = arith.constant 3.100000e+01 : f32
    %22 = vector.broadcast %cst_22 : f32 to vector<16x1xf32>
    %23 = arith.divf %21, %22 : vector<16x1xf32>
    %24 = math.sqrt %23 : vector<16x1xf32>
    %25 = vector.broadcast %10 : vector<1x32xf32> to vector<16x32xf32>
    %26 = arith.mulf %25, %18 : vector<16x32xf32>
    %cst_23 = arith.constant 9.99999997E-7 : f32
    %27 = vector.broadcast %cst_23 : f32 to vector<16x1xf32>
    %28 = arith.addf %24, %27 : vector<16x1xf32>
    %29 = vector.broadcast %28 : vector<16x1xf32> to vector<16x32xf32>
    %30 = arith.divf %26, %29 : vector<16x32xf32>
    %31 = vector.broadcast %12 : vector<1x32xf32> to vector<16x32xf32>
    %32 = arith.addf %30, %31 : vector<16x32xf32>
    %c0_24 = arith.constant 0 : index
    %c0_25 = arith.constant 0 : index
    %c0_26 = arith.constant 0 : index
    %33 = vector.load %arg9[%c0_24, %c0_25, %c0_26] : memref<2x32x48xf32, #tpu.memory_space<vmem>>, vector<1x32x48xf32>
    %34 = vector.shape_cast %33 : vector<1x32x48xf32> to vector<32x48xf32>
    %cst_27 = arith.constant dense<0.000000e+00> : vector<16x48xf32>
    %35 = tpu.matmul %32, %34, %cst_27 {dimension_numbers = #tpu.dot_dimension_numbers<[1], [0], [0], [1], [0, 0, 1, 1], [], []>} : vector<16x32xf32>, vector<32x48xf32>, vector<16x48xf32> -> vector<16x48xf32>
    %36 = vector.extract_strided_slice %35 {offsets = [0, 0], sizes = [16, 16], strides = [1, 1]} : vector<16x48xf32> to vector<16x16xf32>
    %37 = vector.broadcast %5 : f32 to vector<16x16xf32>
    %38 = arith.mulf %36, %37 : vector<16x16xf32>
    %39 = vector.extract_strided_slice %35 {offsets = [0, 16], sizes = [16, 16], strides = [1, 1]} : vector<16x48xf32> to vector<16x16xf32>
    %40 = vector.extract_strided_slice %35 {offsets = [0, 32], sizes = [16, 16], strides = [1, 1]} : vector<16x48xf32> to vector<16x16xf32>
    %c0_28 = arith.constant 0 : index
    %c0_29 = arith.constant 0 : index
    %c0_30 = arith.constant 0 : index
    %41 = vector.load %arg10[%c0_28, %c0_29, %c0_30] : memref<2x16x32xf32, #tpu.memory_space<vmem>>, vector<1x16x32xf32>
    %42 = vector.shape_cast %41 : vector<1x16x32xf32> to vector<16x32xf32>
    %cst_31 = arith.constant 0.000000e+00 : f32
    %43 = vector.broadcast %cst_31 : f32 to vector<16x32xf32>
    %44 = vector.extract_strided_slice %38 {offsets = [0, 0], sizes = [16, 8], strides = [1, 1]} : vector<16x16xf32> to vector<16x8xf32>
    %45 = vector.extract_strided_slice %39 {offsets = [0, 0], sizes = [16, 8], strides = [1, 1]} : vector<16x16xf32> to vector<16x8xf32>
    %46 = vector.extract_strided_slice %40 {offsets = [0, 0], sizes = [16, 8], strides = [1, 1]} : vector<16x16xf32> to vector<16x8xf32>
    %cst_32 = arith.constant dense<0.000000e+00> : vector<16x16xf32>
    %47 = tpu.matmul %44, %45, %cst_32 {dimension_numbers = #tpu.dot_dimension_numbers<[1], [1], [0], [0], [0, 0, 1, 0], [], []>} : vector<16x8xf32>, vector<16x8xf32>, vector<16x16xf32> -> vector<16x16xf32>
    %48 = arith.addf %47, %6 : vector<16x16xf32>
    %cst_33 = arith.constant dense<0xFF800000> : vector<16xf32>
    %49 = vector.multi_reduction <maximumf>, %48, %cst_33 [1] : vector<16x16xf32> to vector<16xf32>
    %cst_34 = arith.constant 0xFF800000 : f32
    %50 = vector.broadcast %cst_34 : f32 to vector<16xf32>
    %51 = arith.maximumf %50, %49 : vector<16xf32>
    %52 = vector.shape_cast %51 : vector<16xf32> to vector<16x1xf32>
    %53 = vector.broadcast %52 : vector<16x1xf32> to vector<16x16xf32>
    %54 = arith.subf %48, %53 : vector<16x16xf32>
    %55 = math.exp %54 : vector<16x16xf32>
    %cst_35 = arith.constant dense<0.000000e+00> : vector<16xf32>
    %56 = vector.multi_reduction <add>, %55, %cst_35 [1] : vector<16x16xf32> to vector<16xf32>
    %57 = vector.shape_cast %56 : vector<16xf32> to vector<16x1xf32>
    %58 = vector.broadcast %57 : vector<16x1xf32> to vector<16x16xf32>
    %59 = arith.divf %55, %58 : vector<16x16xf32>
    %cst_36 = arith.constant dense<0.000000e+00> : vector<16x8xf32>
    %60 = tpu.matmul %59, %46, %cst_36 {dimension_numbers = #tpu.dot_dimension_numbers<[1], [0], [0], [1], [0, 0, 1, 1], [], []>} : vector<16x16xf32>, vector<16x8xf32>, vector<16x8xf32> -> vector<16x8xf32>
    %61 = vector.extract_strided_slice %42 {offsets = [0, 0], sizes = [8, 32], strides = [1, 1]} : vector<16x32xf32> to vector<8x32xf32>
    %cst_37 = arith.constant dense<0.000000e+00> : vector<16x32xf32>
    %62 = tpu.matmul %60, %61, %cst_37 {dimension_numbers = #tpu.dot_dimension_numbers<[1], [0], [0], [1], [0, 0, 1, 1], [], []>} : vector<16x8xf32>, vector<8x32xf32>, vector<16x32xf32> -> vector<16x32xf32>
    %63 = arith.addf %43, %62 : vector<16x32xf32>
    %64 = vector.extract_strided_slice %38 {offsets = [0, 8], sizes = [16, 8], strides = [1, 1]} : vector<16x16xf32> to vector<16x8xf32>
    %65 = vector.extract_strided_slice %39 {offsets = [0, 8], sizes = [16, 8], strides = [1, 1]} : vector<16x16xf32> to vector<16x8xf32>
    %66 = vector.extract_strided_slice %40 {offsets = [0, 8], sizes = [16, 8], strides = [1, 1]} : vector<16x16xf32> to vector<16x8xf32>
    %cst_38 = arith.constant dense<0.000000e+00> : vector<16x16xf32>
    %67 = tpu.matmul %64, %65, %cst_38 {dimension_numbers = #tpu.dot_dimension_numbers<[1], [1], [0], [0], [0, 0, 1, 0], [], []>} : vector<16x8xf32>, vector<16x8xf32>, vector<16x16xf32> -> vector<16x16xf32>
    %68 = arith.addf %67, %6 : vector<16x16xf32>
    %cst_39 = arith.constant dense<0xFF800000> : vector<16xf32>
    %69 = vector.multi_reduction <maximumf>, %68, %cst_39 [1] : vector<16x16xf32> to vector<16xf32>
    %cst_40 = arith.constant 0xFF800000 : f32
    %70 = vector.broadcast %cst_40 : f32 to vector<16xf32>
    %71 = arith.maximumf %70, %69 : vector<16xf32>
    %72 = vector.shape_cast %71 : vector<16xf32> to vector<16x1xf32>
    %73 = vector.broadcast %72 : vector<16x1xf32> to vector<16x16xf32>
    %74 = arith.subf %68, %73 : vector<16x16xf32>
    %75 = math.exp %74 : vector<16x16xf32>
    %cst_41 = arith.constant dense<0.000000e+00> : vector<16xf32>
    %76 = vector.multi_reduction <add>, %75, %cst_41 [1] : vector<16x16xf32> to vector<16xf32>
    %77 = vector.shape_cast %76 : vector<16xf32> to vector<16x1xf32>
    %78 = vector.broadcast %77 : vector<16x1xf32> to vector<16x16xf32>
    %79 = arith.divf %75, %78 : vector<16x16xf32>
    %cst_42 = arith.constant dense<0.000000e+00> : vector<16x8xf32>
    %80 = tpu.matmul %79, %66, %cst_42 {dimension_numbers = #tpu.dot_dimension_numbers<[1], [0], [0], [1], [0, 0, 1, 1], [], []>} : vector<16x16xf32>, vector<16x8xf32>, vector<16x8xf32> -> vector<16x8xf32>
    %81 = vector.extract_strided_slice %42 {offsets = [8, 0], sizes = [8, 32], strides = [1, 1]} : vector<16x32xf32> to vector<8x32xf32>
    %cst_43 = arith.constant dense<0.000000e+00> : vector<16x32xf32>
    %82 = tpu.matmul %80, %81, %cst_43 {dimension_numbers = #tpu.dot_dimension_numbers<[1], [0], [0], [1], [0, 0, 1, 1], [], []>} : vector<16x8xf32>, vector<8x32xf32>, vector<16x32xf32> -> vector<16x32xf32>
    %83 = arith.addf %63, %82 : vector<16x32xf32>
    %84 = arith.addf %4, %83 : vector<16x32xf32>
    %c0_44 = arith.constant 0 : index
    %c0_45 = arith.constant 0 : index
    %c0_46 = arith.constant 0 : index
    %85 = vector.load %arg11[%c0_44, %c0_45, %c0_46] : memref<2x1x32xf32, #tpu.memory_space<vmem>>, vector<1x1x32xf32>
    %86 = vector.shape_cast %85 : vector<1x1x32xf32> to vector<1x32xf32>
    %c0_47 = arith.constant 0 : index
    %c0_48 = arith.constant 0 : index
    %c0_49 = arith.constant 0 : index
    %87 = vector.load %arg12[%c0_47, %c0_48, %c0_49] : memref<2x1x32xf32, #tpu.memory_space<vmem>>, vector<1x1x32xf32>
    %88 = vector.shape_cast %87 : vector<1x1x32xf32> to vector<1x32xf32>
    %cst_50 = arith.constant dense<0.000000e+00> : vector<16xf32>
    %89 = vector.multi_reduction <add>, %84, %cst_50 [1] : vector<16x32xf32> to vector<16xf32>
    %90 = vector.shape_cast %89 : vector<16xf32> to vector<16x1xf32>
    %cst_51 = arith.constant 3.200000e+01 : f32
    %91 = vector.broadcast %cst_51 : f32 to vector<16x1xf32>
    %92 = arith.divf %90, %91 : vector<16x1xf32>
    %93 = vector.broadcast %92 : vector<16x1xf32> to vector<16x32xf32>
    %94 = arith.subf %84, %93 : vector<16x32xf32>
    %95 = arith.mulf %94, %94 : vector<16x32xf32>
    %cst_52 = arith.constant dense<0.000000e+00> : vector<16xf32>
    %96 = vector.multi_reduction <add>, %95, %cst_52 [1] : vector<16x32xf32> to vector<16xf32>
    %97 = vector.shape_cast %96 : vector<16xf32> to vector<16x1xf32>
    %cst_53 = arith.constant 3.100000e+01 : f32
    %98 = vector.broadcast %cst_53 : f32 to vector<16x1xf32>
    %99 = arith.divf %97, %98 : vector<16x1xf32>
    %100 = math.sqrt %99 : vector<16x1xf32>
    %101 = vector.broadcast %86 : vector<1x32xf32> to vector<16x32xf32>
    %102 = arith.mulf %101, %94 : vector<16x32xf32>
    %cst_54 = arith.constant 9.99999997E-7 : f32
    %103 = vector.broadcast %cst_54 : f32 to vector<16x1xf32>
    %104 = arith.addf %100, %103 : vector<16x1xf32>
    %105 = vector.broadcast %104 : vector<16x1xf32> to vector<16x32xf32>
    %106 = arith.divf %102, %105 : vector<16x32xf32>
    %107 = vector.broadcast %88 : vector<1x32xf32> to vector<16x32xf32>
    %108 = arith.addf %106, %107 : vector<16x32xf32>
    %cst_55 = arith.constant dense<0.000000e+00> : vector<16x32xf32>
    %109 = tpu.matmul %7, %108, %cst_55 {dimension_numbers = #tpu.dot_dimension_numbers<[1], [0], [0], [1], [0, 0, 1, 1], [], []>} : vector<16x16xf32>, vector<16x32xf32>, vector<16x32xf32> -> vector<16x32xf32>
    %cst_56 = arith.constant dense<0.000000e+00> : vector<16x32xf32>
    %110 = tpu.matmul %8, %108, %cst_56 {dimension_numbers = #tpu.dot_dimension_numbers<[1], [0], [0], [1], [0, 0, 1, 1], [], []>} : vector<16x16xf32>, vector<16x32xf32>, vector<16x32xf32> -> vector<16x32xf32>
    %111 = tpu.concatenate %109, %108, %110 in 1 : vector<16x32xf32>, vector<16x32xf32>, vector<16x32xf32> -> vector<16x96xf32>
    %c0_57 = arith.constant 0 : index
    %c0_58 = arith.constant 0 : index
    %c0_59 = arith.constant 0 : index
    %112 = vector.load %arg13[%c0_57, %c0_58, %c0_59] : memref<2x96x64xf32, #tpu.memory_space<vmem>>, vector<1x96x64xf32>
    %113 = vector.shape_cast %112 : vector<1x96x64xf32> to vector<96x64xf32>
    %cst_60 = arith.constant dense<0.000000e+00> : vector<16x64xf32>
    %114 = tpu.matmul %111, %113, %cst_60 {dimension_numbers = #tpu.dot_dimension_numbers<[1], [0], [0], [1], [0, 0, 1, 1], [], []>} : vector<16x96xf32>, vector<96x64xf32>, vector<16x64xf32> -> vector<16x64xf32>
    %c0_61 = arith.constant 0 : index
    %c0_62 = arith.constant 0 : index
    %c0_63 = arith.constant 0 : index
    %115 = vector.load %arg14[%c0_61, %c0_62, %c0_63] : memref<2x1x64xf32, #tpu.memory_space<vmem>>, vector<1x1x64xf32>
    %116 = vector.shape_cast %115 : vector<1x1x64xf32> to vector<1x64xf32>
    %117 = vector.broadcast %116 : vector<1x64xf32> to vector<16x64xf32>
    %118 = arith.addf %114, %117 : vector<16x64xf32>
    %cst_64 = arith.constant 0.000000e+00 : f32
    %119 = vector.broadcast %cst_64 : f32 to vector<16x64xf32>
    %120 = arith.maximumf %118, %119 : vector<16x64xf32>
    %cst_65 = arith.constant dense<0.000000e+00> : vector<16x64xf32>
    %121 = tpu.matmul %7, %120, %cst_65 {dimension_numbers = #tpu.dot_dimension_numbers<[1], [0], [0], [1], [0, 0, 1, 1], [], []>} : vector<16x16xf32>, vector<16x64xf32>, vector<16x64xf32> -> vector<16x64xf32>
    %cst_66 = arith.constant dense<0.000000e+00> : vector<16x64xf32>
    %122 = tpu.matmul %8, %120, %cst_66 {dimension_numbers = #tpu.dot_dimension_numbers<[1], [0], [0], [1], [0, 0, 1, 1], [], []>} : vector<16x16xf32>, vector<16x64xf32>, vector<16x64xf32> -> vector<16x64xf32>
    %123 = tpu.concatenate %121, %120, %122 in 1 : vector<16x64xf32>, vector<16x64xf32>, vector<16x64xf32> -> vector<16x192xf32>
    %c0_67 = arith.constant 0 : index
    %c0_68 = arith.constant 0 : index
    %c0_69 = arith.constant 0 : index
    %124 = vector.load %arg15[%c0_67, %c0_68, %c0_69] : memref<2x192x32xf32, #tpu.memory_space<vmem>>, vector<1x192x32xf32>
    %125 = vector.shape_cast %124 : vector<1x192x32xf32> to vector<192x32xf32>
    %cst_70 = arith.constant dense<0.000000e+00> : vector<16x32xf32>
    %126 = tpu.matmul %123, %125, %cst_70 {dimension_numbers = #tpu.dot_dimension_numbers<[1], [0], [0], [1], [0, 0, 1, 1], [], []>} : vector<16x192xf32>, vector<192x32xf32>, vector<16x32xf32> -> vector<16x32xf32>
    %c0_71 = arith.constant 0 : index
    %c0_72 = arith.constant 0 : index
    %c0_73 = arith.constant 0 : index
    %127 = vector.load %arg16[%c0_71, %c0_72, %c0_73] : memref<2x1x32xf32, #tpu.memory_space<vmem>>, vector<1x1x32xf32>
    %128 = vector.shape_cast %127 : vector<1x1x32xf32> to vector<1x32xf32>
    %129 = vector.broadcast %128 : vector<1x32xf32> to vector<16x32xf32>
    %130 = arith.addf %126, %129 : vector<16x32xf32>
    %131 = arith.addf %84, %130 : vector<16x32xf32>
    %c1 = arith.constant 1 : index
    %c0_74 = arith.constant 0 : index
    %c0_75 = arith.constant 0 : index
    %132 = vector.load %arg7[%c1, %c0_74, %c0_75] : memref<2x1x32xf32, #tpu.memory_space<vmem>>, vector<1x1x32xf32>
    %133 = vector.shape_cast %132 : vector<1x1x32xf32> to vector<1x32xf32>
    %c1_76 = arith.constant 1 : index
    %c0_77 = arith.constant 0 : index
    %c0_78 = arith.constant 0 : index
    %134 = vector.load %arg8[%c1_76, %c0_77, %c0_78] : memref<2x1x32xf32, #tpu.memory_space<vmem>>, vector<1x1x32xf32>
    %135 = vector.shape_cast %134 : vector<1x1x32xf32> to vector<1x32xf32>
    %cst_79 = arith.constant dense<0.000000e+00> : vector<16xf32>
    %136 = vector.multi_reduction <add>, %131, %cst_79 [1] : vector<16x32xf32> to vector<16xf32>
    %137 = vector.shape_cast %136 : vector<16xf32> to vector<16x1xf32>
    %cst_80 = arith.constant 3.200000e+01 : f32
    %138 = vector.broadcast %cst_80 : f32 to vector<16x1xf32>
    %139 = arith.divf %137, %138 : vector<16x1xf32>
    %140 = vector.broadcast %139 : vector<16x1xf32> to vector<16x32xf32>
    %141 = arith.subf %131, %140 : vector<16x32xf32>
    %142 = arith.mulf %141, %141 : vector<16x32xf32>
    %cst_81 = arith.constant dense<0.000000e+00> : vector<16xf32>
    %143 = vector.multi_reduction <add>, %142, %cst_81 [1] : vector<16x32xf32> to vector<16xf32>
    %144 = vector.shape_cast %143 : vector<16xf32> to vector<16x1xf32>
    %cst_82 = arith.constant 3.100000e+01 : f32
    %145 = vector.broadcast %cst_82 : f32 to vector<16x1xf32>
    %146 = arith.divf %144, %145 : vector<16x1xf32>
    %147 = math.sqrt %146 : vector<16x1xf32>
    %148 = vector.broadcast %133 : vector<1x32xf32> to vector<16x32xf32>
    %149 = arith.mulf %148, %141 : vector<16x32xf32>
    %cst_83 = arith.constant 9.99999997E-7 : f32
    %150 = vector.broadcast %cst_83 : f32 to vector<16x1xf32>
    %151 = arith.addf %147, %150 : vector<16x1xf32>
    %152 = vector.broadcast %151 : vector<16x1xf32> to vector<16x32xf32>
    %153 = arith.divf %149, %152 : vector<16x32xf32>
    %154 = vector.broadcast %135 : vector<1x32xf32> to vector<16x32xf32>
    %155 = arith.addf %153, %154 : vector<16x32xf32>
    %c1_84 = arith.constant 1 : index
    %c0_85 = arith.constant 0 : index
    %c0_86 = arith.constant 0 : index
    %156 = vector.load %arg9[%c1_84, %c0_85, %c0_86] : memref<2x32x48xf32, #tpu.memory_space<vmem>>, vector<1x32x48xf32>
    %157 = vector.shape_cast %156 : vector<1x32x48xf32> to vector<32x48xf32>
    %cst_87 = arith.constant dense<0.000000e+00> : vector<16x48xf32>
    %158 = tpu.matmul %155, %157, %cst_87 {dimension_numbers = #tpu.dot_dimension_numbers<[1], [0], [0], [1], [0, 0, 1, 1], [], []>} : vector<16x32xf32>, vector<32x48xf32>, vector<16x48xf32> -> vector<16x48xf32>
    %159 = vector.extract_strided_slice %158 {offsets = [0, 0], sizes = [16, 16], strides = [1, 1]} : vector<16x48xf32> to vector<16x16xf32>
    %160 = vector.broadcast %5 : f32 to vector<16x16xf32>
    %161 = arith.mulf %159, %160 : vector<16x16xf32>
    %162 = vector.extract_strided_slice %158 {offsets = [0, 16], sizes = [16, 16], strides = [1, 1]} : vector<16x48xf32> to vector<16x16xf32>
    %163 = vector.extract_strided_slice %158 {offsets = [0, 32], sizes = [16, 16], strides = [1, 1]} : vector<16x48xf32> to vector<16x16xf32>
    %c1_88 = arith.constant 1 : index
    %c0_89 = arith.constant 0 : index
    %c0_90 = arith.constant 0 : index
    %164 = vector.load %arg10[%c1_88, %c0_89, %c0_90] : memref<2x16x32xf32, #tpu.memory_space<vmem>>, vector<1x16x32xf32>
    %165 = vector.shape_cast %164 : vector<1x16x32xf32> to vector<16x32xf32>
    %cst_91 = arith.constant 0.000000e+00 : f32
    %166 = vector.broadcast %cst_91 : f32 to vector<16x32xf32>
    %167 = vector.extract_strided_slice %161 {offsets = [0, 0], sizes = [16, 8], strides = [1, 1]} : vector<16x16xf32> to vector<16x8xf32>
    %168 = vector.extract_strided_slice %162 {offsets = [0, 0], sizes = [16, 8], strides = [1, 1]} : vector<16x16xf32> to vector<16x8xf32>
    %169 = vector.extract_strided_slice %163 {offsets = [0, 0], sizes = [16, 8], strides = [1, 1]} : vector<16x16xf32> to vector<16x8xf32>
    %cst_92 = arith.constant dense<0.000000e+00> : vector<16x16xf32>
    %170 = tpu.matmul %167, %168, %cst_92 {dimension_numbers = #tpu.dot_dimension_numbers<[1], [1], [0], [0], [0, 0, 1, 0], [], []>} : vector<16x8xf32>, vector<16x8xf32>, vector<16x16xf32> -> vector<16x16xf32>
    %171 = arith.addf %170, %6 : vector<16x16xf32>
    %cst_93 = arith.constant dense<0xFF800000> : vector<16xf32>
    %172 = vector.multi_reduction <maximumf>, %171, %cst_93 [1] : vector<16x16xf32> to vector<16xf32>
    %cst_94 = arith.constant 0xFF800000 : f32
    %173 = vector.broadcast %cst_94 : f32 to vector<16xf32>
    %174 = arith.maximumf %173, %172 : vector<16xf32>
    %175 = vector.shape_cast %174 : vector<16xf32> to vector<16x1xf32>
    %176 = vector.broadcast %175 : vector<16x1xf32> to vector<16x16xf32>
    %177 = arith.subf %171, %176 : vector<16x16xf32>
    %178 = math.exp %177 : vector<16x16xf32>
    %cst_95 = arith.constant dense<0.000000e+00> : vector<16xf32>
    %179 = vector.multi_reduction <add>, %178, %cst_95 [1] : vector<16x16xf32> to vector<16xf32>
    %180 = vector.shape_cast %179 : vector<16xf32> to vector<16x1xf32>
    %181 = vector.broadcast %180 : vector<16x1xf32> to vector<16x16xf32>
    %182 = arith.divf %178, %181 : vector<16x16xf32>
    %cst_96 = arith.constant dense<0.000000e+00> : vector<16x8xf32>
    %183 = tpu.matmul %182, %169, %cst_96 {dimension_numbers = #tpu.dot_dimension_numbers<[1], [0], [0], [1], [0, 0, 1, 1], [], []>} : vector<16x16xf32>, vector<16x8xf32>, vector<16x8xf32> -> vector<16x8xf32>
    %184 = vector.extract_strided_slice %165 {offsets = [0, 0], sizes = [8, 32], strides = [1, 1]} : vector<16x32xf32> to vector<8x32xf32>
    %cst_97 = arith.constant dense<0.000000e+00> : vector<16x32xf32>
    %185 = tpu.matmul %183, %184, %cst_97 {dimension_numbers = #tpu.dot_dimension_numbers<[1], [0], [0], [1], [0, 0, 1, 1], [], []>} : vector<16x8xf32>, vector<8x32xf32>, vector<16x32xf32> -> vector<16x32xf32>
    %186 = arith.addf %166, %185 : vector<16x32xf32>
    %187 = vector.extract_strided_slice %161 {offsets = [0, 8], sizes = [16, 8], strides = [1, 1]} : vector<16x16xf32> to vector<16x8xf32>
    %188 = vector.extract_strided_slice %162 {offsets = [0, 8], sizes = [16, 8], strides = [1, 1]} : vector<16x16xf32> to vector<16x8xf32>
    %189 = vector.extract_strided_slice %163 {offsets = [0, 8], sizes = [16, 8], strides = [1, 1]} : vector<16x16xf32> to vector<16x8xf32>
    %cst_98 = arith.constant dense<0.000000e+00> : vector<16x16xf32>
    %190 = tpu.matmul %187, %188, %cst_98 {dimension_numbers = #tpu.dot_dimension_numbers<[1], [1], [0], [0], [0, 0, 1, 0], [], []>} : vector<16x8xf32>, vector<16x8xf32>, vector<16x16xf32> -> vector<16x16xf32>
    %191 = arith.addf %190, %6 : vector<16x16xf32>
    %cst_99 = arith.constant dense<0xFF800000> : vector<16xf32>
    %192 = vector.multi_reduction <maximumf>, %191, %cst_99 [1] : vector<16x16xf32> to vector<16xf32>
    %cst_100 = arith.constant 0xFF800000 : f32
    %193 = vector.broadcast %cst_100 : f32 to vector<16xf32>
    %194 = arith.maximumf %193, %192 : vector<16xf32>
    %195 = vector.shape_cast %194 : vector<16xf32> to vector<16x1xf32>
    %196 = vector.broadcast %195 : vector<16x1xf32> to vector<16x16xf32>
    %197 = arith.subf %191, %196 : vector<16x16xf32>
    %198 = math.exp %197 : vector<16x16xf32>
    %cst_101 = arith.constant dense<0.000000e+00> : vector<16xf32>
    %199 = vector.multi_reduction <add>, %198, %cst_101 [1] : vector<16x16xf32> to vector<16xf32>
    %200 = vector.shape_cast %199 : vector<16xf32> to vector<16x1xf32>
    %201 = vector.broadcast %200 : vector<16x1xf32> to vector<16x16xf32>
    %202 = arith.divf %198, %201 : vector<16x16xf32>
    %cst_102 = arith.constant dense<0.000000e+00> : vector<16x8xf32>
    %203 = tpu.matmul %202, %189, %cst_102 {dimension_numbers = #tpu.dot_dimension_numbers<[1], [0], [0], [1], [0, 0, 1, 1], [], []>} : vector<16x16xf32>, vector<16x8xf32>, vector<16x8xf32> -> vector<16x8xf32>
    %204 = vector.extract_strided_slice %165 {offsets = [8, 0], sizes = [8, 32], strides = [1, 1]} : vector<16x32xf32> to vector<8x32xf32>
    %cst_103 = arith.constant dense<0.000000e+00> : vector<16x32xf32>
    %205 = tpu.matmul %203, %204, %cst_103 {dimension_numbers = #tpu.dot_dimension_numbers<[1], [0], [0], [1], [0, 0, 1, 1], [], []>} : vector<16x8xf32>, vector<8x32xf32>, vector<16x32xf32> -> vector<16x32xf32>
    %206 = arith.addf %186, %205 : vector<16x32xf32>
    %207 = arith.addf %131, %206 : vector<16x32xf32>
    %c1_104 = arith.constant 1 : index
    %c0_105 = arith.constant 0 : index
    %c0_106 = arith.constant 0 : index
    %208 = vector.load %arg11[%c1_104, %c0_105, %c0_106] : memref<2x1x32xf32, #tpu.memory_space<vmem>>, vector<1x1x32xf32>
    %209 = vector.shape_cast %208 : vector<1x1x32xf32> to vector<1x32xf32>
    %c1_107 = arith.constant 1 : index
    %c0_108 = arith.constant 0 : index
    %c0_109 = arith.constant 0 : index
    %210 = vector.load %arg12[%c1_107, %c0_108, %c0_109] : memref<2x1x32xf32, #tpu.memory_space<vmem>>, vector<1x1x32xf32>
    %211 = vector.shape_cast %210 : vector<1x1x32xf32> to vector<1x32xf32>
    %cst_110 = arith.constant dense<0.000000e+00> : vector<16xf32>
    %212 = vector.multi_reduction <add>, %207, %cst_110 [1] : vector<16x32xf32> to vector<16xf32>
    %213 = vector.shape_cast %212 : vector<16xf32> to vector<16x1xf32>
    %cst_111 = arith.constant 3.200000e+01 : f32
    %214 = vector.broadcast %cst_111 : f32 to vector<16x1xf32>
    %215 = arith.divf %213, %214 : vector<16x1xf32>
    %216 = vector.broadcast %215 : vector<16x1xf32> to vector<16x32xf32>
    %217 = arith.subf %207, %216 : vector<16x32xf32>
    %218 = arith.mulf %217, %217 : vector<16x32xf32>
    %cst_112 = arith.constant dense<0.000000e+00> : vector<16xf32>
    %219 = vector.multi_reduction <add>, %218, %cst_112 [1] : vector<16x32xf32> to vector<16xf32>
    %220 = vector.shape_cast %219 : vector<16xf32> to vector<16x1xf32>
    %cst_113 = arith.constant 3.100000e+01 : f32
    %221 = vector.broadcast %cst_113 : f32 to vector<16x1xf32>
    %222 = arith.divf %220, %221 : vector<16x1xf32>
    %223 = math.sqrt %222 : vector<16x1xf32>
    %224 = vector.broadcast %209 : vector<1x32xf32> to vector<16x32xf32>
    %225 = arith.mulf %224, %217 : vector<16x32xf32>
    %cst_114 = arith.constant 9.99999997E-7 : f32
    %226 = vector.broadcast %cst_114 : f32 to vector<16x1xf32>
    %227 = arith.addf %223, %226 : vector<16x1xf32>
    %228 = vector.broadcast %227 : vector<16x1xf32> to vector<16x32xf32>
    %229 = arith.divf %225, %228 : vector<16x32xf32>
    %230 = vector.broadcast %211 : vector<1x32xf32> to vector<16x32xf32>
    %231 = arith.addf %229, %230 : vector<16x32xf32>
    %cst_115 = arith.constant dense<0.000000e+00> : vector<16x32xf32>
    %232 = tpu.matmul %7, %231, %cst_115 {dimension_numbers = #tpu.dot_dimension_numbers<[1], [0], [0], [1], [0, 0, 1, 1], [], []>} : vector<16x16xf32>, vector<16x32xf32>, vector<16x32xf32> -> vector<16x32xf32>
    %cst_116 = arith.constant dense<0.000000e+00> : vector<16x32xf32>
    %233 = tpu.matmul %8, %231, %cst_116 {dimension_numbers = #tpu.dot_dimension_numbers<[1], [0], [0], [1], [0, 0, 1, 1], [], []>} : vector<16x16xf32>, vector<16x32xf32>, vector<16x32xf32> -> vector<16x32xf32>
    %234 = tpu.concatenate %232, %231, %233 in 1 : vector<16x32xf32>, vector<16x32xf32>, vector<16x32xf32> -> vector<16x96xf32>
    %c1_117 = arith.constant 1 : index
    %c0_118 = arith.constant 0 : index
    %c0_119 = arith.constant 0 : index
    %235 = vector.load %arg13[%c1_117, %c0_118, %c0_119] : memref<2x96x64xf32, #tpu.memory_space<vmem>>, vector<1x96x64xf32>
    %236 = vector.shape_cast %235 : vector<1x96x64xf32> to vector<96x64xf32>
    %cst_120 = arith.constant dense<0.000000e+00> : vector<16x64xf32>
    %237 = tpu.matmul %234, %236, %cst_120 {dimension_numbers = #tpu.dot_dimension_numbers<[1], [0], [0], [1], [0, 0, 1, 1], [], []>} : vector<16x96xf32>, vector<96x64xf32>, vector<16x64xf32> -> vector<16x64xf32>
    %c1_121 = arith.constant 1 : index
    %c0_122 = arith.constant 0 : index
    %c0_123 = arith.constant 0 : index
    %238 = vector.load %arg14[%c1_121, %c0_122, %c0_123] : memref<2x1x64xf32, #tpu.memory_space<vmem>>, vector<1x1x64xf32>
    %239 = vector.shape_cast %238 : vector<1x1x64xf32> to vector<1x64xf32>
    %240 = vector.broadcast %239 : vector<1x64xf32> to vector<16x64xf32>
    %241 = arith.addf %237, %240 : vector<16x64xf32>
    %cst_124 = arith.constant 0.000000e+00 : f32
    %242 = vector.broadcast %cst_124 : f32 to vector<16x64xf32>
    %243 = arith.maximumf %241, %242 : vector<16x64xf32>
    %cst_125 = arith.constant dense<0.000000e+00> : vector<16x64xf32>
    %244 = tpu.matmul %7, %243, %cst_125 {dimension_numbers = #tpu.dot_dimension_numbers<[1], [0], [0], [1], [0, 0, 1, 1], [], []>} : vector<16x16xf32>, vector<16x64xf32>, vector<16x64xf32> -> vector<16x64xf32>
    %cst_126 = arith.constant dense<0.000000e+00> : vector<16x64xf32>
    %245 = tpu.matmul %8, %243, %cst_126 {dimension_numbers = #tpu.dot_dimension_numbers<[1], [0], [0], [1], [0, 0, 1, 1], [], []>} : vector<16x16xf32>, vector<16x64xf32>, vector<16x64xf32> -> vector<16x64xf32>
    %246 = tpu.concatenate %244, %243, %245 in 1 : vector<16x64xf32>, vector<16x64xf32>, vector<16x64xf32> -> vector<16x192xf32>
    %c1_127 = arith.constant 1 : index
    %c0_128 = arith.constant 0 : index
    %c0_129 = arith.constant 0 : index
    %247 = vector.load %arg15[%c1_127, %c0_128, %c0_129] : memref<2x192x32xf32, #tpu.memory_space<vmem>>, vector<1x192x32xf32>
    %248 = vector.shape_cast %247 : vector<1x192x32xf32> to vector<192x32xf32>
    %cst_130 = arith.constant dense<0.000000e+00> : vector<16x32xf32>
    %249 = tpu.matmul %246, %248, %cst_130 {dimension_numbers = #tpu.dot_dimension_numbers<[1], [0], [0], [1], [0, 0, 1, 1], [], []>} : vector<16x192xf32>, vector<192x32xf32>, vector<16x32xf32> -> vector<16x32xf32>
    %c1_131 = arith.constant 1 : index
    %c0_132 = arith.constant 0 : index
    %c0_133 = arith.constant 0 : index
    %250 = vector.load %arg16[%c1_131, %c0_132, %c0_133] : memref<2x1x32xf32, #tpu.memory_space<vmem>>, vector<1x1x32xf32>
    %251 = vector.shape_cast %250 : vector<1x1x32xf32> to vector<1x32xf32>
    %252 = vector.broadcast %251 : vector<1x32xf32> to vector<16x32xf32>
    %253 = arith.addf %249, %252 : vector<16x32xf32>
    %254 = arith.addf %207, %253 : vector<16x32xf32>
    %c0_134 = arith.constant 0 : index
    %c0_135 = arith.constant 0 : index
    %255 = vector.load %arg17[%c0_134, %c0_135] : memref<1x32xf32, #tpu.memory_space<vmem>>, vector<1x32xf32>
    %c0_136 = arith.constant 0 : index
    %c0_137 = arith.constant 0 : index
    %256 = vector.load %arg18[%c0_136, %c0_137] : memref<1x32xf32, #tpu.memory_space<vmem>>, vector<1x32xf32>
    %cst_138 = arith.constant dense<0.000000e+00> : vector<16xf32>
    %257 = vector.multi_reduction <add>, %254, %cst_138 [1] : vector<16x32xf32> to vector<16xf32>
    %258 = vector.shape_cast %257 : vector<16xf32> to vector<16x1xf32>
    %cst_139 = arith.constant 3.200000e+01 : f32
    %259 = vector.broadcast %cst_139 : f32 to vector<16x1xf32>
    %260 = arith.divf %258, %259 : vector<16x1xf32>
    %261 = vector.broadcast %260 : vector<16x1xf32> to vector<16x32xf32>
    %262 = arith.subf %254, %261 : vector<16x32xf32>
    %263 = arith.mulf %262, %262 : vector<16x32xf32>
    %cst_140 = arith.constant dense<0.000000e+00> : vector<16xf32>
    %264 = vector.multi_reduction <add>, %263, %cst_140 [1] : vector<16x32xf32> to vector<16xf32>
    %265 = vector.shape_cast %264 : vector<16xf32> to vector<16x1xf32>
    %cst_141 = arith.constant 3.100000e+01 : f32
    %266 = vector.broadcast %cst_141 : f32 to vector<16x1xf32>
    %267 = arith.divf %265, %266 : vector<16x1xf32>
    %268 = math.sqrt %267 : vector<16x1xf32>
    %269 = vector.broadcast %255 : vector<1x32xf32> to vector<16x32xf32>
    %270 = arith.mulf %269, %262 : vector<16x32xf32>
    %cst_142 = arith.constant 9.99999997E-7 : f32
    %271 = vector.broadcast %cst_142 : f32 to vector<16x1xf32>
    %272 = arith.addf %268, %271 : vector<16x1xf32>
    %273 = vector.broadcast %272 : vector<16x1xf32> to vector<16x32xf32>
    %274 = arith.divf %270, %273 : vector<16x32xf32>
    %275 = vector.broadcast %256 : vector<1x32xf32> to vector<16x32xf32>
    %276 = arith.addf %274, %275 : vector<16x32xf32>
    %c0_143 = arith.constant 0 : index
    %c0_144 = arith.constant 0 : index
    %277 = vector.load %arg19[%c0_143, %c0_144] : memref<16x32xf32, #tpu.memory_space<vmem>>, vector<16x32xf32>
    tpu.vector_store %arg19[%c0_143, %c0_144], %276 {strides = array<i32>} : memref<16x32xf32, #tpu.memory_space<vmem>>, vector<16x32xf32>,
    return
  }
  func.func @transform_0(%arg0: i32) -> (i32, i32) {
    %c0_i32 = arith.constant 0 : i32
    %c0_i32_0 = arith.constant 0 : i32
    %c0_i32_1 = arith.constant 0 : i32
    return %c0_i32, %c0_i32_0 : i32, i32
  }
  func.func @transform_1(%arg0: i32) -> (i32, i32) {
    %c0_i32 = arith.constant 0 : i32
    %c0_i32_0 = arith.constant 0 : i32
    %c0_i32_1 = arith.constant 0 : i32
    return %c0_i32, %c0_i32_0 : i32, i32
  }
  func.func @transform_2(%arg0: i32) -> (i32, i32) {
    %c0_i32 = arith.constant 0 : i32
    %c0_i32_0 = arith.constant 0 : i32
    %c0_i32_1 = arith.constant 0 : i32
    return %c0_i32, %c0_i32_0 : i32, i32
  }
  func.func @transform_3(%arg0: i32) -> (i32, i32) {
    %c0_i32 = arith.constant 0 : i32
    %c0_i32_0 = arith.constant 0 : i32
    %c0_i32_1 = arith.constant 0 : i32
    return %c0_i32, %c0_i32_0 : i32, i32
  }
  func.func @transform_4(%arg0: i32) -> (i32, i32) {
    %c0_i32 = arith.constant 0 : i32
    %c0_i32_0 = arith.constant 0 : i32
    %c0_i32_1 = arith.constant 0 : i32
    return %c0_i32, %c0_i32_0 : i32, i32
  }
  func.func @transform_5(%arg0: i32) -> (i32, i32) {
    %c0_i32 = arith.constant 0 : i32
    %c0_i32_0 = arith.constant 0 : i32
    %c0_i32_1 = arith.constant 0 : i32
    return %c0_i32, %c0_i32_0 : i32, i32
  }
  func.func @transform_6(%arg0: i32) -> (i32, i32, i32) {
    %c0_i32 = arith.constant 0 : i32
    %c0_i32_0 = arith.constant 0 : i32
    %c0_i32_1 = arith.constant 0 : i32
    %c0_i32_2 = arith.constant 0 : i32
    return %c0_i32, %c0_i32_0, %c0_i32_1 : i32, i32, i32
  }
  func.func @transform_7(%arg0: i32) -> (i32, i32, i32) {
    %c0_i32 = arith.constant 0 : i32
    %c0_i32_0 = arith.constant 0 : i32
    %c0_i32_1 = arith.constant 0 : i32
    %c0_i32_2 = arith.constant 0 : i32
    return %c0_i32, %c0_i32_0, %c0_i32_1 : i32, i32, i32
  }
  func.func @transform_8(%arg0: i32) -> (i32, i32, i32) {
    %c0_i32 = arith.constant 0 : i32
    %c0_i32_0 = arith.constant 0 : i32
    %c0_i32_1 = arith.constant 0 : i32
    %c0_i32_2 = arith.constant 0 : i32
    return %c0_i32, %c0_i32_0, %c0_i32_1 : i32, i32, i32
  }
  func.func @transform_9(%arg0: i32) -> (i32, i32, i32) {
    %c0_i32 = arith.constant 0 : i32
    %c0_i32_0 = arith.constant 0 : i32
    %c0_i32_1 = arith.constant 0 : i32
    %c0_i32_2 = arith.constant 0 : i32
    return %c0_i32, %c0_i32_0, %c0_i32_1 : i32, i32, i32
  }
  func.func @transform_10(%arg0: i32) -> (i32, i32, i32) {
    %c0_i32 = arith.constant 0 : i32
    %c0_i32_0 = arith.constant 0 : i32
    %c0_i32_1 = arith.constant 0 : i32
    %c0_i32_2 = arith.constant 0 : i32
    return %c0_i32, %c0_i32_0, %c0_i32_1 : i32, i32, i32
  }
  func.func @transform_11(%arg0: i32) -> (i32, i32, i32) {
    %c0_i32 = arith.constant 0 : i32
    %c0_i32_0 = arith.constant 0 : i32
    %c0_i32_1 = arith.constant 0 : i32
    %c0_i32_2 = arith.constant 0 : i32
    return %c0_i32, %c0_i32_0, %c0_i32_1 : i32, i32, i32
  }
  func.func @transform_12(%arg0: i32) -> (i32, i32, i32) {
    %c0_i32 = arith.constant 0 : i32
    %c0_i32_0 = arith.constant 0 : i32
    %c0_i32_1 = arith.constant 0 : i32
    %c0_i32_2 = arith.constant 0 : i32
    return %c0_i32, %c0_i32_0, %c0_i32_1 : i32, i32, i32
  }
  func.func @transform_13(%arg0: i32) -> (i32, i32, i32) {
    %c0_i32 = arith.constant 0 : i32
    %c0_i32_0 = arith.constant 0 : i32
    %c0_i32_1 = arith.constant 0 : i32
    %c0_i32_2 = arith.constant 0 : i32
    return %c0_i32, %c0_i32_0, %c0_i32_1 : i32, i32, i32
  }
  func.func @transform_14(%arg0: i32) -> (i32, i32, i32) {
    %c0_i32 = arith.constant 0 : i32
    %c0_i32_0 = arith.constant 0 : i32
    %c0_i32_1 = arith.constant 0 : i32
    %c0_i32_2 = arith.constant 0 : i32
    return %c0_i32, %c0_i32_0, %c0_i32_1 : i32, i32, i32
  }
  func.func @transform_15(%arg0: i32) -> (i32, i32, i32) {
    %c0_i32 = arith.constant 0 : i32
    %c0_i32_0 = arith.constant 0 : i32
    %c0_i32_1 = arith.constant 0 : i32
    %c0_i32_2 = arith.constant 0 : i32
    return %c0_i32, %c0_i32_0, %c0_i32_1 : i32, i32, i32
  }
  func.func @transform_16(%arg0: i32) -> (i32, i32) {
    %c0_i32 = arith.constant 0 : i32
    %c0_i32_0 = arith.constant 0 : i32
    %c0_i32_1 = arith.constant 0 : i32
    return %c0_i32, %c0_i32_0 : i32, i32
  }
  func.func @transform_17(%arg0: i32) -> (i32, i32) {
    %c0_i32 = arith.constant 0 : i32
    %c0_i32_0 = arith.constant 0 : i32
    %c0_i32_1 = arith.constant 0 : i32
    return %c0_i32, %c0_i32_0 : i32, i32
  }
  func.func @transform_18(%arg0: i32) -> (i32, i32) {
    %c0_i32 = arith.constant 0 : i32
    %c0_i32_0 = arith.constant 0 : i32
    %c0_i32_1 = arith.constant 0 : i32
    return %c0_i32, %c0_i32_0 : i32, i32
  }
}

</mosaic_0001>

<bundles_post_ra>
// kernel: tpu_custom_call.1
= control target key start
LH: loop header
LB: loop body
LE: loop exit
PB: predicated region body
PF: predicated region fallthrough
CT: control target
= control target key end

     0   :  { %s4438_s0 = inlined_call_operand.vmem [shape: f32[16,32], index: 0, kind: input, shape index: {}]   ;;  %s4439_s1 = inlined_call_operand.vmem [shape: f32[16,32], index: 1, kind: input, shape index: {}]   ;;  %s4440_s2 = inlined_call_operand.vmem [shape: f32[16,16], index: 2, kind: input, shape index: {}]   ;;  %s4441_s3 = inlined_call_operand.vmem [shape: f32[16,16], index: 3, kind: input, shape index: {}]   ;;  %s4442_s4 = inlined_call_operand.vmem [shape: f32[16,16], index: 4, kind: input, shape index: {}]   ;;  %s4443_s5 = inlined_call_operand.vmem [shape: f32[32,32], index: 5, kind: input, shape index: {}]   ;;  %s4444_s6 = inlined_call_operand.vmem [shape: f32[2,1,32], index: 6, kind: input, shape index: {}]   ;;  %s4445_s7 = inlined_call_operand.vmem [shape: f32[2,1,32], index: 7, kind: input, shape index: {}]   ;;  %s4446_s8 = inlined_call_operand.vmem [shape: f32[2,32,48], index: 8, kind: input, shape index: {}]   ;;  %s4447_s9 = inlined_call_operand.vmem [shape: f32[2,16,32], index: 9, kind: input, shape index: {}]   ;;  %s4448_s10 = inlined_call_operand.vmem [shape: f32[2,1,32], index: 10, kind: input, shape index: {}]   ;;  %s4449_s11 = inlined_call_operand.vmem [shape: f32[2,1,32], index: 11, kind: input, shape index: {}]   ;;  %s4450_s12 = inlined_call_operand.vmem [shape: f32[2,96,64], index: 12, kind: input, shape index: {}]   ;;  %s4451_s13 = inlined_call_operand.vmem [shape: f32[2,1,64], index: 13, kind: input, shape index: {}]   ;;  %s4452_s14 = inlined_call_operand.vmem [shape: f32[2,192,32], index: 14, kind: input, shape index: {}]   ;;  %s4453_s15 = inlined_call_operand.vmem [shape: f32[2,1,32], index: 15, kind: input, shape index: {}]   ;;  %s4454_s16 = inlined_call_operand.vmem [shape: f32[1,32], index: 16, kind: input, shape index: {}]   ;;  %s4455_s17 = inlined_call_operand.vmem [shape: f32[1,32], index: 17, kind: input, shape index: {}]   ;;  %s4456_s18 = inlined_call_operand.hbm [shape: f32[16,32], index: 18, kind: output, shape index: {}]  }
   0x1   :  { %4460 = sst [smem:[#allocation5_spill]] %s4438_s0 }
   0x2   :  { %4461 = sst [smem:[#allocation6_spill]] %s4439_s1 }
   0x3   :  { %4462 = sst [smem:[#allocation7_spill]] %s4440_s2 }
   0x4   :  { %v62_v0 = vld [vmem:[%s4443_s5] sm:$0xff]  ;;  %v63_v1 = vld [vmem:[%s4443_s5 + $0x8] sm:$0xff]  ;;  %v64_v2 = vld [vmem:[%s4443_s5 + $0x10] sm:$0xff]  ;;  %vm68_vm0 = vcmask 261120   ;;  %s4463_s2 = sld [smem:[#allocation5_spill]] }
   0x5   :  { %v3355_v3 = vpack.c.bf16 %v63_v1, %v62_v0  ;;  %v65_v4 = vld [vmem:[%s4443_s5 + $0x18] sm:$0xff] }
   0x6   :  { %v3359_v6 = vpack.c.bf16 %v65_v4, %v64_v2 }
   0xa   :  { %v60_v5 = vld [vmem:[%s4463_s2] sm:$0xff] }
   0xb   :  { %3144 = vmatprep.mubr.msk.f32.mxu0 %vm68_vm0, %v60_v5 }
   0xc   :  { %23 = vsyncpa [#allocation3], 0  ;;  %3356 = vmatprep.subr.bf16.mxu0 %v3355_v3  ;;  %v61_v7 = vld [vmem:[%s4463_s2 + $0x8] sm:$0xff]  ;;  %s4464_s26 = sld [smem:[#allocation6_spill]]  ;;  %v216_v26 = vld [vmem:[%s4446_s8] sm:$0xff]  ;;  %vm311_vm5 = vcmask 64512  }
   0xd   :  { %3358 = vmatpush3.bf16.msra.mxu0 %v3355_v3  ;;  %v217_v27 = vld [vmem:[%s4446_s8 + $0x8] sm:$0xff]  ;;  %v218_v28 = vld [vmem:[%s4446_s8 + $0x10] sm:$0xff]  ;;  %v219_v30 = vld [vmem:[%s4446_s8 + $0x18] sm:$0xff]  ;;  %s3722_s5 = smov 104   ;;  %s3724_s27 = smov 120   ;;  %vm397_vm7 = vcmask 130048  }
   0xe   :  { %3360 = vmatprep.subr.bf16.mxu0 %v3359_v6  ;;  %v3363_v29 = vpack.c.bf16 %v217_v27, %v216_v26  ;;  %v3367_v31 = vpack.c.bf16 %v219_v30, %v218_v28  ;;  %v2892_v48 = vld [vmem:[%s4444_s6] ss:$0 sm:$0xff]  ;;  %vm3897_vm6 = vmpackc.low %vm311_vm5, %vm311_vm5  ;;  %s4467_s30 = sld [smem:[#allocation7_spill]]  ;;  %s3725_s1 = smov 88   ;;  %vm1109_vm12 = vcmask 523264   ;;  %vm1131_vm13 = vcmask 785408  }
   0xf   :  { %v2893_v51 = vld [vmem:[%s4445_s7] ss:$0 sm:$0xff]  ;;  %s3726_s20 = smov 96   ;;  %s3727_s19 = smov 32  }
  0x10   :  { %3364 = vmatprep.subr.bf16.mxu1 %v3363_v29  ;;  %s3730_s23 = smov [#allocation2]  }
  0x11   :  { %3362 = vmatpush3.bf16.msra.mxu0 %v3359_v6  ;;  %3366 = vmatpush3.bf16.msra.mxu1 %v3363_v29 }
  0x12   :  { %v66_v8 = vld [vmem:[%s4464_s26] sm:$0xff]  ;;  %v67_v10 = vld [vmem:[%s4464_s26 + $0x8] sm:$0xff]  ;;  %3368 = vmatprep.subr.bf16.mxu1 %v3367_v31  ;;  %s3723_s26 = smov 112  }
  0x14   :  { %3145 = vmatmul.mubr.msk.f32.vlgmr.msra.gmra.mrb[0].mxu0 %vm68_vm0, %v61_v7 }
  0x15   :  { %3370 = vmatpush3.bf16.msra.mxu1 %v3367_v31 }
  0xe7   :  { %v3146_v9 = vpop.f32.mrb[0].mxu0 }
  0xe8   :  { %v141_v11 = vpop.f32.mrb[1].mxu0  ;;  %v3856_v13 = vadd.f32 %v3146_v9, %v67_v10  ;;  %v3915_v10 = vld [vmem:[%s4467_s30 + $0x8] sm:$0xff] }
  0xe9   :  { %v3854_v12 = vadd.f32 %v141_v11, %v66_v8  ;;  %v3920_v11 = vld [vmem:[%s4467_s30] sm:$0xff] }
  0xea   :  { %v161_v15 = vsel %vm68_vm0, %v3856_v13, 0.0 }
  0xeb   :  { %v158_v14 = vsel %vm68_vm0, %v3854_v12, 0.0 }
  0xec   :  { %159 = vadd.xlane.f32.xlu0 %v158_v14 }
  0xf0   :  { %162 = vadd.xlane.f32.xlu0 %v161_v15 }
 0x179   :  { %v160_v16 = vpop.xlane.xlu0 %159 }
 0x17a   :  { %v165_v17 = vmul.f32 0.03125, %v160_v16 }
 0x17c   :  { %v167_v18 = vsub.f32 %v3854_v12, %v165_v17 }
 0x17d   :  { %v163_v19 = vpop.xlane.xlu0 %162 }
 0x17e   :  { %v166_v20 = vmul.f32 0.03125, %v163_v19  ;;  %v169_v21 = vmul.f32 %v167_v18, %v167_v18  ;;  %v200_v49 = vmul.f32 %v2892_v48, %v167_v18 }
 0x180   :  { %v168_v22 = vsub.f32 %v3856_v13, %v166_v20  ;;  %v171_v23 = vsel %vm68_vm0, %v169_v21, 0.0 }
 0x181   :  { %172 = vadd.xlane.f32.xlu1 %v171_v23 }
 0x182   :  { %v170_v24 = vmul.f32 %v168_v22, %v168_v22  ;;  %v201_v53 = vmul.f32 %v2892_v48, %v168_v22 }
 0x184   :  { %v174_v25 = vsel %vm68_vm0, %v170_v24, 0.0 }
 0x185   :  { %175 = vadd.xlane.f32.xlu1 %v174_v25 }
 0x20e   :  { %v173_v32 = vpop.xlane.xlu1 %172 }
 0x20f   :  { %v178_v33 = vmul.f32 0.032258064, %v173_v32 }
 0x211   :  { %3626 = vrsqrt.f32 %v178_v33  ;;  %vm182_vm1 = vcmp.eq.f32.partialorder %v178_v33, inf  ;;  %v185_v38 = vand.u32 2147483648, %v178_v33  ;;  %vm184_vm2 = vcmp.eq.f32.partialorder %v178_v33, 0.0 }
 0x212   :  { %v176_v34 = vpop.xlane.xlu1 %175 }
 0x213   :  { %v179_v35 = vmul.f32 0.032258064, %v176_v34 }
 0x215   :  { %3628 = vrsqrt.f32 %v179_v35  ;;  %vm189_vm3 = vcmp.eq.f32.partialorder %v179_v35, inf  ;;  %v192_v44 = vand.u32 2147483648, %v179_v35  ;;  %vm191_vm4 = vcmp.eq.f32.partialorder %v179_v35, 0.0 }
 0x21b   :  { %v3627_v36 = vpop.eup %3626 }
 0x21c   :  { %v181_v37 = vmul.f32 %v3627_v36, %v178_v33 }
 0x21e   :  { %v183_v39 = vsel %vm182_vm1, %v178_v33, %v181_v37 }
 0x21f   :  { %v3629_v40 = vpop.eup %3628  ;;  %v186_v41 = vsel %vm184_vm2, %v185_v38, %v183_v39 }
 0x220   :  { %v188_v42 = vmul.f32 %v3629_v40, %v179_v35  ;;  %v202_v43 = vadd.f32 1e-06, %v186_v41 }
 0x222   :  { %v190_v45 = vsel %vm189_vm3, %v179_v35, %v188_v42  ;;  %3630 = vrcp.f32 %v202_v43 }
 0x223   :  { %v193_v46 = vsel %vm191_vm4, %v192_v44, %v190_v45 }
 0x224   :  { %v203_v47 = vadd.f32 1e-06, %v193_v46 }
 0x226   :  { %3632 = vrcp.f32 %v203_v47 }
 0x22c   :  { %v3631_v50 = vpop.eup %3630 }
 0x22d   :  { %v205_v52 = vmul.f32 %v3631_v50, %v200_v49 }
 0x22f   :  { %v214_v54 = vadd.f32 %v2893_v51, %v205_v52 }
 0x230   :  { %v3633_v55 = vpop.eup %3632 }
 0x231   :  { %v207_v56 = vmul.f32 %v3633_v55, %v201_v53  ;;  %3155 = vmatprep.mubr.msk.f32.mxu1 %vm68_vm0, %v214_v54 }
 0x233   :  { %v215_v57 = vadd.f32 %v2893_v51, %v207_v56 }
 0x235   :  { %3156 = vmatmul.mubr.msk.f32.vlgmr.msra.gmra.mrb[0].mxu1 %vm68_vm0, %v215_v57 }
 0x308   :  { %v3157_v58 = vpop.f32.mrb[0].mxu1 }
 0x309   :  { %v292_v59 = vpop.f32.mrb[1].mxu1  ;;  %v302_v62 = vmul.f32 0.35355338, %v3157_v58 }
 0x30a   :  { %v3886_v60 = vpack.i.bf16 %v3157_v58, %v292_v59  ;;  %v301_v61 = vmul.f32 0.35355338, %v292_v59 }
 0x30c   :  { %3592 = vrot.lane.b32.xlu1 %v3886_v60, %s3722_s5  ;;  %3587 = vrot.lane.b32.xlu0 %v3886_v60, %s3723_s26 }
 0x30d   :  { %3162 = vmatprep.mubr.msk.f32.mxu0 %vm311_vm5, %v301_v61 }
 0x310   :  { %507 = vrot.lane.b32.xlu1 %v301_v61, %s3724_s27 }
 0x314   :  { %509 = vrot.lane.b32.xlu1 %v302_v62, %s3724_s27 }
 0x37e   :  { %v3593_v63 = vpop.permute.xlu1 %3592  ;;  %v3588_v0 = vpop.permute.xlu0 %3587 }
 0x37f   :  { %v3595_v1 = vunpack.i.h.bf16 %v3593_v63  ;;  %v3594_v2 = vunpack.i.l.bf16 %v3593_v63  ;;  %v3590_v3 = vunpack.i.h.bf16 %v3588_v0  ;;  %v3589_v4 = vunpack.i.l.bf16 %v3588_v0 }
 0x381   :  { %v3381_v6 = vpack.c.bf16 %v3595_v1, %v3594_v2  ;;  %v3371_v7 = vpack.c.bf16 %v3590_v3, %v3589_v4  ;;  %v304_v2 = vld [vmem:[%s4447_s9 + $0x8] sm:$0xff]  ;;  %v303_v3 = vld [vmem:[%s4447_s9] sm:$0xff] }
 0x382   :  { %v508_v8 = vpop.permute.xlu1 %507 }
 0x383   :  { %3373 = vmatprep.subr.msk.bf16.mxu0 %vm3897_vm6, %v3371_v7  ;;  %3383 = vmatprep.subr.msk.bf16.mxu1 %vm3897_vm6, %v3381_v6 }
 0x384   :  { %3176 = vmatprep.mubr.msk.f32.mxu1 %vm311_vm5, %v508_v8  ;;  %3376 = vmatpush3.bf16.xpose.msk.msra.mxu0 %vm3897_vm6, %v3371_v7 }
 0x385   :  { %3386 = vmatpush3.bf16.xpose.msk.msra.mxu1 %vm3897_vm6, %v3381_v6 }
 0x386   :  { %v510_v9 = vpop.permute.xlu1 %509 }
 0x38b   :  { %3163 = vmatmul.mubr.msk.f32.vlgmr.msra.gmra.mrb[2].mxu0 %vm311_vm5, %v302_v62 }
 0x38c   :  { %3177 = vmatmul.mubr.msk.f32.vlgmr.msra.gmra.mrb[2].mxu1 %vm311_vm5, %v510_v9 }
 0x45e   :  { %v3164_v14 = vpop.f32.mrb[2].mxu0 }
 0x45f   :  { %v394_v15 = vadd.f32 %v3164_v14, %v3915_v10  ;;  %v3178_v16 = vpop.f32.mrb[2].mxu1  ;;  %v388_v17 = vpop.f32.mrb[3].mxu0 }
 0x460   :  { %v389_v18 = vadd.f32 %v388_v17, %v3920_v11  ;;  %v589_v19 = vpop.f32.mrb[3].mxu1  ;;  %v595_v23 = vadd.f32 %v3178_v16, %v3915_v10 }
 0x461   :  { %v401_v20 = vsel %vm397_vm7, %v394_v15, -inf  ;;  %v590_v21 = vadd.f32 %v589_v19, %v3920_v11 }
 0x462   :  { %402 = vmax.xlane.f32.xlu1 %v401_v20  ;;  %v398_v22 = vsel %vm397_vm7, %v389_v18, -inf  ;;  %v601_v25 = vsel %vm397_vm7, %v595_v23, -inf }
 0x463   :  { %399 = vmax.xlane.f32.xlu0 %v398_v22  ;;  %v598_v24 = vsel %vm397_vm7, %v590_v21, -inf }
 0x467   :  { %599 = vmax.xlane.f32.xlu0 %v598_v24 }
 0x46b   :  { %602 = vmax.xlane.f32.xlu0 %v601_v25 }
 0x4ef   :  { %v403_v26 = vpop.xlane.xlu1 %402 }
 0x4f0   :  { %v405_v27 = vsub.f32 %v394_v15, %v403_v26  ;;  %v400_v28 = vpop.xlane.xlu0 %399 }
 0x4f1   :  { %v404_v29 = vsub.f32 %v389_v18, %v400_v28 }
 0x4f2   :  { %v408_v30 = vmul.f32 1.442695, %v405_v27  ;;  %v3969_v27 = vld [vmem:[%s4441_s3] sm:$0xff] }
 0x4f3   :  { %v406_v31 = vmul.f32 1.442695, %v404_v29  ;;  %3200 = vmatprep.mubr.msk.f32.mxu1 %vm397_vm7, %v3969_v27 }
 0x4f4   :  { %3634 = vpow2.f32 %v408_v30  ;;  %v600_v32 = vpop.xlane.xlu0 %599 }
 0x4f5   :  { %3636 = vpow2.f32 %v406_v31  ;;  %v604_v33 = vsub.f32 %v590_v21, %v600_v32 }
 0x4f7   :  { %v606_v34 = vmul.f32 1.442695, %v604_v33 }
 0x4f8   :  { %v603_v35 = vpop.xlane.xlu0 %602 }
 0x4f9   :  { %3638 = vpow2.f32 %v606_v34  ;;  %v605_v36 = vsub.f32 %v595_v23, %v603_v35 }
 0x4fb   :  { %v608_v37 = vmul.f32 1.442695, %v605_v36 }
 0x4fd   :  { %3640 = vpow2.f32 %v608_v37 }
 0x4fe   :  { %v3635_v38 = vpop.eup %3634 }
 0x4ff   :  { %v3637_v39 = vpop.eup %3636  ;;  %v413_v40 = vsel %vm397_vm7, %v3635_v38, 0.0 }
 0x500   :  { %414 = vadd.xlane.f32.xlu1 %v413_v40  ;;  %v410_v41 = vsel %vm397_vm7, %v3637_v39, 0.0 }
 0x501   :  { %411 = vadd.xlane.f32.xlu0 %v410_v41 }
 0x503   :  { %v3639_v42 = vpop.eup %3638 }
 0x504   :  { %v610_v43 = vsel %vm397_vm7, %v3639_v42, 0.0 }
 0x505   :  { %611 = vadd.xlane.f32.xlu0 %v610_v43 }
 0x507   :  { %v3641_v44 = vpop.eup %3640 }
 0x508   :  { %v613_v45 = vsel %vm397_vm7, %v3641_v44, 0.0 }
 0x509   :  { %614 = vadd.xlane.f32.xlu1 %v613_v45 }
 0x51a   :  { %3602 = vrot.lane.b32.xlu1 %v3886_v60, %s3725_s1 }
 0x51b   :  { %3597 = vrot.lane.b32.xlu0 %v3886_v60, %s3726_s20 }
 0x58d   :  { %v415_v46 = vpop.xlane.xlu1 %414 }
 0x58e   :  { %v412_v47 = vpop.xlane.xlu0 %411 }
 0x58f   :  { %3642 = vrcp.f32 %v412_v47 }
 0x590   :  { %3644 = vrcp.f32 %v415_v46 }
 0x592   :  { %v612_v48 = vpop.xlane.xlu0 %611 }
 0x593   :  { %3646 = vrcp.f32 %v612_v48  ;;  %v2913_v48 = vld [vmem:[%s4449_s11] ss:$0 sm:$0xff] }
 0x596   :  { %v615_v49 = vpop.xlane.xlu1 %614  ;;  %v3598_v50 = vpop.permute.xlu0 %3597 }
 0x597   :  { %3648 = vrcp.f32 %v615_v49  ;;  %v3600_v51 = vunpack.i.h.bf16 %v3598_v50  ;;  %v3599_v52 = vunpack.i.l.bf16 %v3598_v50 }
 0x599   :  { %v3643_v53 = vpop.eup %3642  ;;  %v3377_v54 = vpack.c.bf16 %v3600_v51, %v3599_v52 }
 0x59a   :  { %v3645_v55 = vpop.eup %3644  ;;  %v3603_v56 = vpop.permute.xlu1 %3602  ;;  %v417_v57 = vmul.f32 %v3643_v53, %v3637_v39 }
 0x59b   :  { %v3605_v58 = vunpack.i.h.bf16 %v3603_v56  ;;  %v3604_v59 = vunpack.i.l.bf16 %v3603_v56  ;;  %3378 = vmatprep.subr.bf16.mxu0 %v3377_v54  ;;  %v419_v61 = vmul.f32 %v3645_v55, %v3635_v38  ;;  %v3984_v55 = vld [vmem:[%s4441_s3 + $0x8] sm:$0xff]  ;;  %v3989_v56 = vld [vmem:[%s4442_s4] sm:$0xff]  ;;  %s3728_s3 = smov 64  }
 0x59c   :  { %3380 = vmatpush3.bf16.msra.mxu0 %v3377_v54  ;;  %3169 = vmatprep.mubr.msk.f32.mxu0 %vm397_vm7, %v417_v57  ;;  %v3998_v57 = vld [vmem:[%s4442_s4 + $0x8] sm:$0xff] }
 0x59d   :  { %v3647_v60 = vpop.eup %3646  ;;  %v3387_v62 = vpack.c.bf16 %v3605_v58, %v3604_v59  ;;  %v1112_v58 = vld [vmem:[%s4450_s12] sm:$0xff]  ;;  %v1113_v59 = vld [vmem:[%s4450_s12 + $0x8] sm:$0xff] }
 0x59e   :  { %v617_v63 = vmul.f32 %v3647_v60, %v3639_v42  ;;  %v1114_v60 = vld [vmem:[%s4450_s12 + $0x10] sm:$0xff] }
 0x59f   :  { %3170 = vmatmul.mubr.msk.f32.vlgmr.msra.gmra.mrb[4].mxu0 %vm397_vm7, %v419_v61  ;;  %3388 = vmatprep.subr.bf16.mxu0 %v3387_v62  ;;  %v3399_v61 = vpack.c.bf16 %v1113_v59, %v1112_v58  ;;  %v1386_v58 = vld [vmem:[%s4452_s14 + $0x58] sm:$0xff] }
 0x5a0   :  { %3390 = vmatpush3.bf16.msra.mxu0 %v3387_v62  ;;  %3183 = vmatprep.mubr.msk.f32.mxu0 %vm397_vm7, %v617_v63  ;;  %v1115_v62 = vld [vmem:[%s4450_s12 + $0x18] sm:$0xff] }
 0x5a1   :  { %v3649_v0 = vpop.eup %3648  ;;  %3186 = vmatprep.subr.mxu0 %v304_v2  ;;  %v3403_v63 = vpack.c.bf16 %v1115_v62, %v1114_v60  ;;  %v1387_v60 = vld [vmem:[%s4452_s14 + $0x60] sm:$0xff] }
 0x5a2   :  { %v619_v1 = vmul.f32 %v3649_v0, %v3641_v44  ;;  %v2912_v44 = vld [vmem:[%s4448_s10] ss:$0 sm:$0xff] }
 0x5a3   :  { %v1116_v0 = vld [vmem:[%s4450_s12 + $0x20] sm:$0xff] }
 0x5a4   :  { %3184 = vmatmul.mubr.msk.f32.vlgmr.msra.gmra.mrb[6].mxu0 %vm397_vm7, %v619_v1  ;;  %v1117_v1 = vld [vmem:[%s4450_s12 + $0x28] sm:$0xff] }
 0x5a5   :  { %3187 = vmatpush3.msra.mxu0 %v304_v2  ;;  %v3407_v2 = vpack.c.bf16 %v1117_v1, %v1116_v0  ;;  %v1390_v0 = vld [vmem:[%s4452_s14 + $0x78] sm:$0xff] }
 0x5a6   :  { %3191 = vmatprep.subr.mxu0 %v303_v3 }
 0x672   :  { %v3171_v4 = vpop.f32.mrb[4].mxu0 }
 0x673   :  { %v498_v6 = vpop.f32.mrb[5].mxu0 }
 0x677   :  { %v3185_v7 = vpop.f32.mrb[6].mxu0 }
 0x678   :  { %v698_v8 = vpop.f32.mrb[7].mxu0 }
 0x679   :  { %3188 = vmatprep.mubr.msk.f32.mxu0 %vm311_vm5, %v698_v8  ;;  %v1121_v8 = vld [vmem:[%s4450_s12 + $0x48] sm:$0xff] }
 0x67a   :  { %3189 = vmatmul.mubr.msk.f32.vlgmr.msra.gmra.mrb[8].mxu0 %vm311_vm5, %v3185_v7  ;;  %v1120_v7 = vld [vmem:[%s4450_s12 + $0x40] sm:$0xff] }
 0x67b   :  { %3192 = vmatpush3.msra.mxu0 %v303_v3  ;;  %3193 = vmatprep.mubr.msk.f32.mxu0 %vm311_vm5, %v498_v6  ;;  %v1118_v3 = vld [vmem:[%s4450_s12 + $0x30] sm:$0xff] }
 0x682   :  { %3194 = vmatmul.mubr.msk.f32.vlgmr.msra.gmra.mrb[8].mxu0 %vm311_vm5, %v3171_v4  ;;  %v1119_v4 = vld [vmem:[%s4450_s12 + $0x38] sm:$0xff] }
 0x683   :  { %v3411_v6 = vpack.c.bf16 %v1119_v4, %v1118_v3  ;;  %v1392_v3 = vld [vmem:[%s4452_s14 + $0x88] sm:$0xff] }
 0x755   :  { %v3195_v9 = vpop.f32.mrb[8].mxu0 }
 0x756   :  { %v3953_v14 = vadd.f32 %v3195_v9, %v3856_v13  ;;  %v860_v15 = vpop.f32.mrb[9].mxu0  ;;  %v3415_v9 = vpack.c.bf16 %v1121_v8, %v1120_v7  ;;  %v1394_v7 = vld [vmem:[%s4452_s14 + $0x98] sm:$0xff] }
 0x757   :  { %v3956_v16 = vadd.f32 %v860_v15, %v3854_v12  ;;  %v1122_v15 = vld [vmem:[%s4450_s12 + $0x50] sm:$0xff] }
 0x758   :  { %v876_v17 = vsel %vm68_vm0, %v3953_v14, 0.0 }
 0x759   :  { %877 = vadd.xlane.f32.xlu0 %v876_v17  ;;  %v873_v18 = vsel %vm68_vm0, %v3956_v16, 0.0  ;;  %v1123_v17 = vld [vmem:[%s4450_s12 + $0x58] sm:$0xff] }
 0x75a   :  { %874 = vadd.xlane.f32.xlu1 %v873_v18  ;;  %v3419_v18 = vpack.c.bf16 %v1123_v17, %v1122_v15  ;;  %v1396_v15 = vld [vmem:[%s4452_s14 + $0xa8] sm:$0xff] }
 0x7e6   :  { %v878_v19 = vpop.xlane.xlu0 %877 }
 0x7e7   :  { %v880_v20 = vmul.f32 0.03125, %v878_v19  ;;  %v875_v21 = vpop.xlane.xlu1 %874 }
 0x7e8   :  { %v879_v22 = vmul.f32 0.03125, %v875_v21 }
 0x7e9   :  { %v882_v23 = vsub.f32 %v3953_v14, %v880_v20 }
 0x7ea   :  { %v881_v13 = vsub.f32 %v3956_v16, %v879_v22 }
 0x7eb   :  { %v884_v24 = vmul.f32 %v882_v23, %v882_v23  ;;  %v914_v45 = vmul.f32 %v2912_v44, %v882_v23 }
 0x7ec   :  { %v883_v25 = vmul.f32 %v881_v13, %v881_v13  ;;  %v913_v47 = vmul.f32 %v2912_v44, %v881_v13 }
 0x7ed   :  { %v888_v12 = vsel %vm68_vm0, %v884_v24, 0.0 }
 0x7ee   :  { %889 = vadd.xlane.f32.xlu1 %v888_v12  ;;  %v885_v26 = vsel %vm68_vm0, %v883_v25, 0.0 }
 0x7ef   :  { %886 = vadd.xlane.f32.xlu0 %v885_v26 }
 0x87b   :  { %v890_v28 = vpop.xlane.xlu1 %889 }
 0x87c   :  { %v892_v29 = vmul.f32 0.032258064, %v890_v28  ;;  %v887_v30 = vpop.xlane.xlu0 %886 }
 0x87d   :  { %v891_v31 = vmul.f32 0.032258064, %v887_v30  ;;  %v2918_v30 = vld [vmem:[%s4451_s13] ss:$0 sm:$0xff] }
 0x87e   :  { %3650 = vrsqrt.f32 %v892_v29  ;;  %vm902_vm8 = vcmp.eq.f32.partialorder %v892_v29, inf  ;;  %v905_v35 = vand.u32 2147483648, %v892_v29  ;;  %vm904_vm9 = vcmp.eq.f32.partialorder %v892_v29, 0.0 }
 0x87f   :  { %3652 = vrsqrt.f32 %v891_v31  ;;  %vm895_vm10 = vcmp.eq.f32.partialorder %v891_v31, inf  ;;  %v898_v38 = vand.u32 2147483648, %v891_v31  ;;  %vm897_vm11 = vcmp.eq.f32.partialorder %v891_v31, 0.0 }
 0x888   :  { %v3651_v32 = vpop.eup %3650 }
 0x889   :  { %v3653_v33 = vpop.eup %3652  ;;  %v901_v34 = vmul.f32 %v3651_v32, %v892_v29 }
 0x88a   :  { %v894_v36 = vmul.f32 %v3653_v33, %v891_v31 }
 0x88b   :  { %v903_v37 = vsel %vm902_vm8, %v892_v29, %v901_v34 }
 0x88c   :  { %v896_v39 = vsel %vm895_vm10, %v891_v31, %v894_v36  ;;  %v906_v40 = vsel %vm904_vm9, %v905_v35, %v903_v37 }
 0x88d   :  { %v916_v41 = vadd.f32 1e-06, %v906_v40  ;;  %v899_v42 = vsel %vm897_vm11, %v898_v38, %v896_v39  ;;  %v1375_v38 = vld [vmem:[%s4452_s14] sm:$0xff]  ;;  %v1376_v39 = vld [vmem:[%s4452_s14 + $0x8] sm:$0xff] }
 0x88e   :  { %v915_v43 = vadd.f32 1e-06, %v899_v42  ;;  %v3432_v40 = vpack.c.bf16 %v1376_v39, %v1375_v38  ;;  %v1377_v42 = vld [vmem:[%s4452_s14 + $0x10] sm:$0xff] }
 0x88f   :  { %3654 = vrcp.f32 %v916_v41  ;;  %v3729_v41 = vmov 0.0|0.0  }
 0x890   :  { %3656 = vrcp.f32 %v915_v43  ;;  %v1378_v43 = vld [vmem:[%s4452_s14 + $0x18] sm:$0xff] }
 0x891   :  { %v3435_v44 = vpack.c.bf16 %v1378_v43, %v1377_v42 }
 0x899   :  { %v3655_v46 = vpop.eup %3654 }
 0x89a   :  { %v3657_v49 = vpop.eup %3656  ;;  %v920_v50 = vmul.f32 %v3655_v46, %v914_v45  ;;  %v1379_v45 = vld [vmem:[%s4452_s14 + $0x20] sm:$0xff]  ;;  %v1380_v46 = vld [vmem:[%s4452_s14 + $0x28] sm:$0xff] }
 0x89b   :  { %v918_v51 = vmul.f32 %v3657_v49, %v913_v47  ;;  %v3438_v47 = vpack.c.bf16 %v1380_v46, %v1379_v45  ;;  %v1382_v49 = vld [vmem:[%s4452_s14 + $0x38] sm:$0xff] }
 0x89c   :  { %v928_v52 = vadd.f32 %v2913_v48, %v920_v50 }
 0x89d   :  { %v927_v53 = vadd.f32 %v2913_v48, %v918_v51  ;;  %v1381_v48 = vld [vmem:[%s4452_s14 + $0x30] sm:$0xff]  ;;  %v1383_v51 = vld [vmem:[%s4452_s14 + $0x40] sm:$0xff] }
 0x89e   :  { %1095 = vrot.lane.b32.xlu1 %v928_v52, %s3727_s19  ;;  %v3441_v50 = vpack.c.bf16 %v1382_v49, %v1381_v48  ;;  %v2932_v48 = vld [vmem:[%s4446_s8 + $0x20] sm:$0xff]  ;;  %v2933_v49 = vld [vmem:[%s4446_s8 + $0x28] sm:$0xff] }
 0x89f   :  { %1093 = vrot.lane.b32.xlu0 %v927_v53, %s3727_s19  ;;  %v3391_v54 = vpack.c.bf16 %v928_v52, %v927_v53  ;;  %v1384_v52 = vld [vmem:[%s4452_s14 + $0x48] sm:$0xff] }
 0x8a0   :  { %v3444_v53 = vpack.c.bf16 %v1384_v52, %v1383_v51  ;;  %v3467_v51 = vpack.c.bf16 %v2933_v49, %v2932_v48  ;;  %v2935_v52 = vld [vmem:[%s4446_s8 + $0x38] sm:$0xff] }
 0x8a1   :  { %3392 = vmatprep.subr.bf16.mxu1 %v3391_v54 }
 0x8a2   :  { %3394 = vmatpush3.bf16.msra.mxu1 %v3391_v54  ;;  %3468 = vmatprep.subr.bf16.mxu0 %v3467_v51 }
 0x8a3   :  { %3396 = vmatprep.subr.bf16.mxu1 %v3391_v54  ;;  %3470 = vmatpush3.bf16.msra.mxu0 %v3467_v51 }
 0x8a5   :  { %3201 = vmatmul.mubr.msk.f32.vlgmr.msra.gmra.mrb[4].mxu1 %vm397_vm7, %v3984_v55 }
 0x8a6   :  { %3398 = vmatpush3.bf16.msra.mxu1 %v3391_v54  ;;  %3207 = vmatprep.mubr.msk.f32.mxu1 %vm397_vm7, %v3989_v56  ;;  %v1385_v54 = vld [vmem:[%s4452_s14 + $0x50] sm:$0xff] }
 0x8a7   :  { %3400 = vmatprep.subr.bf16.mxu1 %v3399_v61  ;;  %v3447_v59 = vpack.c.bf16 %v1386_v58, %v1385_v54 }
 0x8a9   :  { %3208 = vmatmul.mubr.msk.f32.vlgmr.msra.gmra.mrb[6].mxu1 %vm397_vm7, %v3998_v57 }
 0x8aa   :  { %3402 = vmatpush3.bf16.msra.mxu1 %v3399_v61  ;;  %v1388_v61 = vld [vmem:[%s4452_s14 + $0x68] sm:$0xff] }
 0x8ab   :  { %3404 = vmatprep.subr.bf16.mxu1 %v3403_v63  ;;  %v3450_v62 = vpack.c.bf16 %v1388_v61, %v1387_v60 }
 0x8ae   :  { %3406 = vmatpush3.bf16.msra.mxu1 %v3403_v63  ;;  %v1389_v63 = vld [vmem:[%s4452_s14 + $0x70] sm:$0xff] }
 0x8af   :  { %3408 = vmatprep.subr.bf16.mxu1 %v3407_v2  ;;  %v3453_v1 = vpack.c.bf16 %v1390_v0, %v1389_v63 }
 0x8b2   :  { %3410 = vmatpush3.bf16.msra.mxu1 %v3407_v2  ;;  %v1391_v2 = vld [vmem:[%s4452_s14 + $0x80] sm:$0xff] }
 0x8b3   :  { %3412 = vmatprep.subr.bf16.mxu1 %v3411_v6  ;;  %v3456_v4 = vpack.c.bf16 %v1392_v3, %v1391_v2 }
 0x8b6   :  { %3414 = vmatpush3.bf16.msra.mxu1 %v3411_v6  ;;  %v1393_v6 = vld [vmem:[%s4452_s14 + $0x90] sm:$0xff] }
 0x8b7   :  { %3416 = vmatprep.subr.bf16.mxu1 %v3415_v9  ;;  %v3459_v8 = vpack.c.bf16 %v1394_v7, %v1393_v6 }
 0x8ba   :  { %3418 = vmatpush3.bf16.msra.mxu1 %v3415_v9  ;;  %v1395_v9 = vld [vmem:[%s4452_s14 + $0xa0] sm:$0xff] }
 0x8bb   :  { %3420 = vmatprep.subr.bf16.mxu1 %v3419_v18  ;;  %v3462_v17 = vpack.c.bf16 %v1396_v15, %v1395_v9  ;;  %v2930_v15 = vld [vmem:[%s4444_s6 + $0x1] ss:$0 sm:$0xff] }
 0x8be   :  { %3422 = vmatpush3.bf16.msra.mxu1 %v3419_v18  ;;  %v1397_v18 = vld [vmem:[%s4452_s14 + $0xb0] sm:$0xff] }
 0x910   :  { %v1096_v23 = vpop.permute.xlu1 %1095 }
 0x911   :  { %v1094_v13 = vpop.permute.xlu0 %1093 }
 0x978   :  { %v3202_v19 = vpop.f32.mrb[4].mxu1 }
 0x979   :  { %v1001_v20 = vpop.f32.mrb[5].mxu1  ;;  %v1108_v26 = vsel %vm68_vm0, %v3202_v19, %v1096_v23  ;;  %v1398_v19 = vld [vmem:[%s4452_s14 + $0xb8] sm:$0xff] }
 0x97a   :  { %v1107_v24 = vsel %vm68_vm0, %v1001_v20, %v1094_v13  ;;  %v3465_v20 = vpack.c.bf16 %v1398_v19, %v1397_v18  ;;  %v2931_v19 = vld [vmem:[%s4445_s7 + $0x1] ss:$0 sm:$0xff] }
 0x97c   :  { %v3209_v21 = vpop.f32.mrb[6].mxu1 }
 0x97d   :  { %v1082_v22 = vpop.f32.mrb[7].mxu1 }
 0x97e   :  { %1101 = vrot.lane.b32.xlu1 %v1082_v22, %s3728_s3 }
 0x982   :  { %1103 = vrot.lane.b32.xlu1 %v3209_v21, %s3728_s3 }
 0x9f0   :  { %v1102_v25 = vpop.permute.xlu1 %1101 }
 0x9f1   :  { %v1110_v12 = vsel %vm1109_vm12, %v1107_v24, %v1102_v25 }
 0x9f2   :  { %3234 = vmatprep.mubr.msk.f32.mxu1 %vm1131_vm13, %v1110_v12 }
 0x9f4   :  { %v1104_v28 = vpop.permute.xlu1 %1103 }
 0x9f5   :  { %v1111_v29 = vsel %vm1109_vm12, %v1108_v26, %v1104_v28  ;;  %v2925_v28 = vld [vmem:[%s4453_s15] ss:$0 sm:$0xff] }
 0x9f6   :  { %3235 = vmatmul.mubr.msk.f32.vlgmr.msra.gmra.mrb[8].mxu1 %vm1131_vm13, %v1111_v29 }
 0x9f7   :  { %3241 = vmatprep.mubr.msk.f32.mxu1 %vm397_vm7, %v3969_v27 }
 0xac9   :  { %v3236_v31 = vpop.f32.mrb[8].mxu1 }
 0xaca   :  { %v1210_v32 = vadd.f32 %v3236_v31, %v2918_v30  ;;  %v1204_v33 = vpop.f32.mrb[9].mxu1 }
 0xacb   :  { %v1205_v34 = vadd.f32 %v2918_v30, %v1204_v33 }
 0xacc   :  { %v1214_v35 = vmax.f32 %v1210_v32, 0.0 }
 0xacd   :  { %v1213_v36 = vmax.f32 %v1205_v34, 0.0 }
 0xace   :  { %1369 = vrot.lane.b32.xlu1 %v1214_v35, %s3728_s3 }
 0xacf   :  { %v3423_v37 = vpack.c.bf16 %v1214_v35, %v1213_v36  ;;  %1367 = vrot.lane.b32.xlu0 %v1213_v36, %s3728_s3 }
 0xad1   :  { %3424 = vmatprep.subr.bf16.mxu1 %v3423_v37 }
 0xad2   :  { %3426 = vmatpush3.bf16.msra.mxu1 %v3423_v37 }
 0xad3   :  { %3428 = vmatprep.subr.bf16.mxu1 %v3423_v37 }
 0xad5   :  { %3242 = vmatmul.mubr.msk.f32.vlgmr.msra.gmra.mrb[10].mxu1 %vm397_vm7, %v3984_v55 }
 0xad6   :  { %3430 = vmatpush3.bf16.msra.mxu1 %v3423_v37  ;;  %3248 = vmatprep.mubr.msk.f32.mxu1 %vm397_vm7, %v3989_v56 }
 0xad7   :  { %3431 = vmatprep.subr.bf16.mxu1 %v3729_v41 }
 0xad9   :  { %3249 = vmatmul.mubr.msk.f32.vlgmr.msra.gmra.mrb[12].mxu1 %vm397_vm7, %v3998_v57 }
 0xada   :  { %3433 = vmatpush1.bf16.msra.mxu1 %v3432_v40 }
 0xadb   :  { %3434 = vmatprep.subr.bf16.mxu1 %v3729_v41 }
 0xade   :  { %3436 = vmatpush1.bf16.msra.mxu1 %v3435_v44 }
 0xadf   :  { %3437 = vmatprep.subr.bf16.mxu1 %v3729_v41 }
 0xae2   :  { %3439 = vmatpush1.bf16.msra.mxu1 %v3438_v47 }
 0xae3   :  { %3440 = vmatprep.subr.bf16.mxu1 %v3729_v41 }
 0xae6   :  { %3442 = vmatpush1.bf16.msra.mxu1 %v3441_v50  ;;  %v2934_v50 = vld [vmem:[%s4446_s8 + $0x30] sm:$0xff] }
 0xae7   :  { %3443 = vmatprep.subr.bf16.mxu1 %v3729_v41 }
 0xaea   :  { %3445 = vmatpush1.bf16.msra.mxu1 %v3444_v53  ;;  %v3471_v53 = vpack.c.bf16 %v2935_v52, %v2934_v50 }
 0xaeb   :  { %3446 = vmatprep.subr.bf16.mxu1 %v3729_v41 }
 0xaec   :  { %3472 = vmatprep.subr.bf16.mxu0 %v3471_v53 }
 0xaed   :  { %3474 = vmatpush3.bf16.msra.mxu0 %v3471_v53 }
 0xaee   :  { %3448 = vmatpush1.bf16.msra.mxu1 %v3447_v59 }
 0xaef   :  { %3449 = vmatprep.subr.bf16.mxu1 %v3729_v41 }
 0xaf2   :  { %3451 = vmatpush1.bf16.msra.mxu1 %v3450_v62 }
 0xaf3   :  { %3452 = vmatprep.subr.bf16.mxu1 %v3729_v41 }
 0xaf6   :  { %3454 = vmatpush1.bf16.msra.mxu1 %v3453_v1 }
 0xaf7   :  { %3455 = vmatprep.subr.bf16.mxu1 %v3729_v41 }
 0xafa   :  { %3457 = vmatpush1.bf16.msra.mxu1 %v3456_v4 }
 0xafb   :  { %3458 = vmatprep.subr.bf16.mxu1 %v3729_v41 }
 0xafe   :  { %3460 = vmatpush1.bf16.msra.mxu1 %v3459_v8 }
 0xaff   :  { %3461 = vmatprep.subr.bf16.mxu1 %v3729_v41 }
 0xb02   :  { %3463 = vmatpush1.bf16.msra.mxu1 %v3462_v17 }
 0xb03   :  { %3464 = vmatprep.subr.bf16.mxu1 %v3729_v41 }
 0xb06   :  { %3466 = vmatpush1.bf16.msra.mxu1 %v3465_v20 }
 0xb40   :  { %v1370_v12 = vpop.permute.xlu1 %1369 }
 0xb41   :  { %v1368_v13 = vpop.permute.xlu0 %1367 }
 0xba8   :  { %v3243_v21 = vpop.f32.mrb[10].mxu1 }
 0xba9   :  { %v1281_v22 = vpop.f32.mrb[11].mxu1  ;;  %v1374_v26 = vsel %vm1109_vm12, %v3243_v21, %v1370_v12 }
 0xbaa   :  { %v1373_v25 = vsel %vm1109_vm12, %v1281_v22, %v1368_v13 }
 0xbac   :  { %v3250_v23 = vpop.f32.mrb[12].mxu1 }
 0xbad   :  { %v1356_v24 = vpop.f32.mrb[13].mxu1 }
 0xbae   :  { %2926 = vmatprep.mubr.msk.f32.mxu1 %vm1109_vm12, %v1356_v24 }
 0xbaf   :  { %1477 = vmatmul.mubr.f32.vlgmr.msra.gmra.mrb[14].mxu1 %v1373_v25 }
 0xbb0   :  { %2927 = vmatprep.mubr.msk.f32.mxu1 %vm1109_vm12, %v3250_v23 }
 0xbb3   :  { %1482 = vmatmul.mubr.f32.gmra.mrb[16].mxu1 %v1374_v26 }
 0xbb4   :  { %3304 = vmatprep.mubr.msk.f32.mxu1 %vm397_vm7, %v3969_v27 }
 0xc82   :  { %v1478_v29 = vpop.f32.mrb[14].mxu1 }
 0xc83   :  { %v1479_v30 = vadd.f32 %v2925_v28, %v1478_v29  ;;  %v1480_v31 = vpop.f32.mrb[15].mxu1 }
 0xc85   :  { %v4153_v32 = vadd.f32 %v1479_v30, %v3956_v16 }
 0xc86   :  { %v1483_v33 = vpop.f32.mrb[16].mxu1 }
 0xc87   :  { %v1484_v34 = vadd.f32 %v2925_v28, %v1483_v33  ;;  %v1485_v35 = vpop.f32.mrb[17].mxu1  ;;  %v1493_v36 = vsel %vm68_vm0, %v4153_v32, 0.0 }
 0xc88   :  { %1494 = vadd.xlane.f32.xlu0 %v1493_v36 }
 0xc89   :  { %v4158_v37 = vadd.f32 %v1484_v34, %v3953_v14 }
 0xc8b   :  { %v1496_v38 = vsel %vm68_vm0, %v4158_v37, 0.0 }
 0xc8c   :  { %1497 = vadd.xlane.f32.xlu1 %v1496_v38 }
 0xd15   :  { %v1495_v39 = vpop.xlane.xlu0 %1494 }
 0xd16   :  { %v1499_v40 = vmul.f32 0.03125, %v1495_v39 }
 0xd18   :  { %v1501_v42 = vsub.f32 %v4153_v32, %v1499_v40 }
 0xd19   :  { %v1498_v16 = vpop.xlane.xlu1 %1497 }
 0xd1a   :  { %v1500_v43 = vmul.f32 0.03125, %v1498_v16  ;;  %v1503_v44 = vmul.f32 %v1501_v42, %v1501_v42  ;;  %v1533_v17 = vmul.f32 %v2930_v15, %v1501_v42 }
 0xd1c   :  { %v1502_v45 = vsub.f32 %v4158_v37, %v1500_v43  ;;  %v1505_v46 = vsel %vm68_vm0, %v1503_v44, 0.0 }
 0xd1d   :  { %1506 = vadd.xlane.f32.xlu0 %v1505_v46 }
 0xd1e   :  { %v1504_v47 = vmul.f32 %v1502_v45, %v1502_v45  ;;  %v1534_v21 = vmul.f32 %v2930_v15, %v1502_v45 }
 0xd20   :  { %v1508_v14 = vsel %vm68_vm0, %v1504_v47, 0.0 }
 0xd21   :  { %1509 = vadd.xlane.f32.xlu0 %v1508_v14 }
 0xdaa   :  { %v1507_v54 = vpop.xlane.xlu0 %1506 }
 0xdab   :  { %v1511_v58 = vmul.f32 0.032258064, %v1507_v54 }
 0xdad   :  { %3658 = vrsqrt.f32 %v1511_v58  ;;  %vm1515_vm14 = vcmp.eq.f32.partialorder %v1511_v58, inf  ;;  %v1518_v63 = vand.u32 2147483648, %v1511_v58  ;;  %vm1517_vm15 = vcmp.eq.f32.partialorder %v1511_v58, 0.0 }
 0xdae   :  { %v1510_v59 = vpop.xlane.xlu0 %1509 }
 0xdaf   :  { %v1512_v60 = vmul.f32 0.032258064, %v1510_v59 }
 0xdb1   :  { %3660 = vrsqrt.f32 %v1512_v60  ;;  %vm1522_vm1 = vcmp.eq.f32.partialorder %v1512_v60, inf  ;;  %v1525_v6 = vand.u32 2147483648, %v1512_v60  ;;  %vm1524_vm2 = vcmp.eq.f32.partialorder %v1512_v60, 0.0 }
 0xdb7   :  { %v3659_v61 = vpop.eup %3658 }
 0xdb8   :  { %v1514_v62 = vmul.f32 %v3659_v61, %v1511_v58 }
 0xdba   :  { %v1516_v0 = vsel %vm1515_vm14, %v1511_v58, %v1514_v62 }
 0xdbb   :  { %v3661_v1 = vpop.eup %3660  ;;  %v1519_v2 = vsel %vm1517_vm15, %v1518_v63, %v1516_v0 }
 0xdbc   :  { %v1521_v3 = vmul.f32 %v3661_v1, %v1512_v60  ;;  %v1535_v4 = vadd.f32 1e-06, %v1519_v2 }
 0xdbe   :  { %v1523_v7 = vsel %vm1522_vm1, %v1512_v60, %v1521_v3  ;;  %3662 = vrcp.f32 %v1535_v4 }
 0xdbf   :  { %v1526_v8 = vsel %vm1524_vm2, %v1525_v6, %v1523_v7 }
 0xdc0   :  { %v1536_v9 = vadd.f32 1e-06, %v1526_v8 }
 0xdc2   :  { %3664 = vrcp.f32 %v1536_v9 }
 0xdc8   :  { %v3663_v18 = vpop.eup %3662 }
 0xdc9   :  { %v1538_v20 = vmul.f32 %v3663_v18, %v1533_v17 }
 0xdcb   :  { %v1547_v22 = vadd.f32 %v2931_v19, %v1538_v20 }
 0xdcc   :  { %v3665_v23 = vpop.eup %3664 }
 0xdcd   :  { %v1540_v13 = vmul.f32 %v3665_v23, %v1534_v21  ;;  %3259 = vmatprep.mubr.msk.f32.mxu0 %vm68_vm0, %v1547_v22 }
 0xdcf   :  { %v1548_v24 = vadd.f32 %v2931_v19, %v1540_v13 }
 0xdd1   :  { %3260 = vmatmul.mubr.msk.f32.vlgmr.msra.gmra.mrb[10].mxu0 %vm68_vm0, %v1548_v24 }
 0xea4   :  { %v3261_v25 = vpop.f32.mrb[10].mxu0 }
 0xea5   :  { %v1626_v12 = vpop.f32.mrb[11].mxu0  ;;  %v1636_v29 = vmul.f32 0.35355338, %v3261_v25 }
 0xea6   :  { %v4186_v26 = vpack.i.bf16 %v3261_v25, %v1626_v12  ;;  %v1635_v28 = vmul.f32 0.35355338, %v1626_v12 }
 0xea8   :  { %3607 = vrot.lane.b32.xlu0 %v4186_v26, %s3723_s26  ;;  %3266 = vmatprep.mubr.msk.f32.mxu0 %vm311_vm5, %v1635_v28 }
 0xeac   :  { %3617 = vrot.lane.b32.xlu0 %v4186_v26, %s3722_s5 }
 0xeb0   :  { %1840 = vrot.lane.b32.xlu0 %v1635_v28, %s3724_s27 }
 0xeb4   :  { %1842 = vrot.lane.b32.xlu0 %v1636_v29, %s3724_s27 }
 0xf1a   :  { %v3608_v30 = vpop.permute.xlu0 %3607 }
 0xf1b   :  { %v3610_v31 = vunpack.i.h.bf16 %v3608_v30  ;;  %v3609_v33 = vunpack.i.l.bf16 %v3608_v30 }
 0xf1d   :  { %v3475_v34 = vpack.c.bf16 %v3610_v31, %v3609_v33  ;;  %v2939_v31 = vld [vmem:[%s4447_s9 + $0x18] sm:$0xff] }
 0xf1e   :  { %v3618_v53 = vpop.permute.xlu0 %3617 }
 0xf1f   :  { %3477 = vmatprep.subr.msk.bf16.mxu0 %vm3897_vm6, %v3475_v34  ;;  %v3620_v58 = vunpack.i.h.bf16 %v3618_v53  ;;  %v3619_v59 = vunpack.i.l.bf16 %v3618_v53 }
 0xf20   :  { %3480 = vmatpush3.bf16.xpose.msk.msra.mxu0 %vm3897_vm6, %v3475_v34 }
 0xf21   :  { %v3485_v63 = vpack.c.bf16 %v3620_v58, %v3619_v59 }
 0xf22   :  { %v1841_v4 = vpop.permute.xlu0 %1840 }
 0xf26   :  { %v1843_v6 = vpop.permute.xlu0 %1842 }
 0xf27   :  { %3267 = vmatmul.mubr.msk.f32.vlgmr.msra.gmra.mrb[12].mxu0 %vm311_vm5, %v1636_v29 }
 0xffa   :  { %v3268_v35 = vpop.f32.mrb[12].mxu0 }
 0xffb   :  { %v1722_v36 = vpop.f32.mrb[13].mxu0  ;;  %v1728_v39 = vadd.f32 %v3268_v35, %v3915_v10 }
 0xffc   :  { %v1723_v38 = vadd.f32 %v1722_v36, %v3920_v11 }
 0xffd   :  { %v1734_v42 = vsel %vm397_vm7, %v1728_v39, -inf }
 0xffe   :  { %v1731_v40 = vsel %vm397_vm7, %v1723_v38, -inf }
 0xfff   :  { %1732 = vmax.xlane.f32.xlu1 %v1731_v40  ;;  %v2938_v40 = vld [vmem:[%s4447_s9 + $0x10] sm:$0xff] }
0x1003   :  { %1735 = vmax.xlane.f32.xlu1 %v1734_v42 }
0x108c   :  { %v1733_v16 = vpop.xlane.xlu1 %1732 }
0x108d   :  { %v1737_v43 = vsub.f32 %v1723_v38, %v1733_v16 }
0x108f   :  { %v1739_v46 = vmul.f32 1.442695, %v1737_v43 }
0x1090   :  { %v1736_v44 = vpop.xlane.xlu1 %1735 }
0x1091   :  { %v1738_v45 = vsub.f32 %v1728_v39, %v1736_v44 }
0x1093   :  { %v1741_v47 = vmul.f32 1.442695, %v1738_v45 }
0x1095   :  { %3666 = vpow2.f32 %v1741_v47 }
0x1096   :  { %3668 = vpow2.f32 %v1739_v46 }
0x109f   :  { %v3667_v14 = vpop.eup %3666 }
0x10a0   :  { %v1746_v48 = vsel %vm397_vm7, %v3667_v14, 0.0  ;;  %v3669_v49 = vpop.eup %3668 }
0x10a1   :  { %1747 = vadd.xlane.f32.xlu1 %v1746_v48  ;;  %v1743_v50 = vsel %vm397_vm7, %v3669_v49, 0.0 }
0x10a5   :  { %1744 = vadd.xlane.f32.xlu1 %v1743_v50 }
0x10b6   :  { %3612 = vrot.lane.b32.xlu1 %v4186_v26, %s3726_s20 }
0x112e   :  { %v1748_v51 = vpop.xlane.xlu1 %1747 }
0x112f   :  { %3670 = vrcp.f32 %v1748_v51 }
0x1132   :  { %v1745_v52 = vpop.xlane.xlu1 %1744 }
0x1133   :  { %3672 = vrcp.f32 %v1745_v52 }
0x1136   :  { %v3613_v54 = vpop.permute.xlu1 %3612 }
0x1137   :  { %v3615_v60 = vunpack.i.h.bf16 %v3613_v54  ;;  %v3614_v61 = vunpack.i.l.bf16 %v3613_v54 }
0x1139   :  { %v3481_v62 = vpack.c.bf16 %v3615_v60, %v3614_v61  ;;  %v3671_v0 = vpop.eup %3670 }
0x113a   :  { %v1752_v3 = vmul.f32 %v3671_v0, %v3667_v14 }
0x113b   :  { %3482 = vmatprep.subr.bf16.mxu0 %v3481_v62 }
0x113c   :  { %3484 = vmatpush3.bf16.msra.mxu0 %v3481_v62 }
0x113d   :  { %v3673_v1 = vpop.eup %3672  ;;  %3487 = vmatprep.subr.msk.bf16.mxu0 %vm3897_vm6, %v3485_v63 }
0x113e   :  { %v1750_v2 = vmul.f32 %v3673_v1, %v3669_v49 }
0x1140   :  { %3273 = vmatprep.mubr.msk.f32.mxu0 %vm397_vm7, %v1750_v2 }
0x1141   :  { %3274 = vmatmul.mubr.msk.f32.vlgmr.msra.gmra.mrb[14].mxu0 %vm397_vm7, %v1752_v3 }
0x1142   :  { %3280 = vmatprep.mubr.msk.f32.mxu0 %vm311_vm5, %v1841_v4 }
0x1145   :  { %3490 = vmatpush3.bf16.xpose.msk.msra.mxu0 %vm3897_vm6, %v3485_v63 }
0x114c   :  { %3281 = vmatmul.mubr.msk.f32.vlgmr.msra.gmra.mrb[16].mxu0 %vm311_vm5, %v1843_v6 }
0x1214   :  { %v3275_v7 = vpop.f32.mrb[14].mxu0 }
0x1215   :  { %v1831_v8 = vpop.f32.mrb[15].mxu0 }
0x121f   :  { %v3282_v9 = vpop.f32.mrb[16].mxu0 }
0x1220   :  { %v1928_v15 = vadd.f32 %v3282_v9, %v3915_v10  ;;  %v1922_v17 = vpop.f32.mrb[17].mxu0 }
0x1221   :  { %v1923_v18 = vadd.f32 %v1922_v17, %v3920_v11 }
0x1222   :  { %v1934_v19 = vsel %vm397_vm7, %v1928_v15, -inf }
0x1223   :  { %1935 = vmax.xlane.f32.xlu0 %v1934_v19  ;;  %v1931_v20 = vsel %vm397_vm7, %v1923_v18, -inf }
0x1224   :  { %1932 = vmax.xlane.f32.xlu1 %v1931_v20 }
0x1235   :  { %3622 = vrot.lane.b32.xlu1 %v4186_v26, %s3725_s1 }
0x12b0   :  { %v1936_v5 = vpop.xlane.xlu0 %1935 }
0x12b1   :  { %v1938_v21 = vsub.f32 %v1928_v15, %v1936_v5  ;;  %v1933_v22 = vpop.xlane.xlu1 %1932  ;;  %v2959_v5 = vld [vmem:[%s4449_s11 + $0x1] ss:$0 sm:$0xff] }
0x12b2   :  { %v1937_v23 = vsub.f32 %v1923_v18, %v1933_v22  ;;  %v2958_v18 = vld [vmem:[%s4448_s10 + $0x1] ss:$0 sm:$0xff] }
0x12b3   :  { %v1941_v13 = vmul.f32 1.442695, %v1938_v21 }
0x12b4   :  { %v1939_v24 = vmul.f32 1.442695, %v1937_v23 }
0x12b5   :  { %v3623_v25 = vpop.permute.xlu1 %3622 }
0x12b6   :  { %3674 = vpow2.f32 %v1939_v24  ;;  %v3625_v10 = vunpack.i.h.bf16 %v3623_v25  ;;  %v3624_v12 = vunpack.i.l.bf16 %v3623_v25 }
0x12b7   :  { %3676 = vpow2.f32 %v1941_v13 }
0x12b8   :  { %v3491_v11 = vpack.c.bf16 %v3625_v10, %v3624_v12  ;;  %v2964_v12 = vld [vmem:[%s4450_s12 + $0x60] sm:$0xff] }
0x12ba   :  { %3492 = vmatprep.subr.bf16.mxu0 %v3491_v11 }
0x12bb   :  { %3494 = vmatpush3.bf16.msra.mxu0 %v3491_v11  ;;  %v2965_v11 = vld [vmem:[%s4450_s12 + $0x68] sm:$0xff] }
0x12bc   :  { %3290 = vmatprep.subr.mxu0 %v2939_v31 }
0x12c0   :  { %v3675_v28 = vpop.eup %3674 }
0x12c1   :  { %v1943_v29 = vsel %vm397_vm7, %v3675_v28, 0.0  ;;  %v3677_v30 = vpop.eup %3676 }
0x12c2   :  { %1944 = vadd.xlane.f32.xlu0 %v1943_v29  ;;  %v1946_v26 = vsel %vm397_vm7, %v3677_v30, 0.0  ;;  %v3503_v29 = vpack.c.bf16 %v2965_v11, %v2964_v12  ;;  %v3000_v11 = vld [vmem:[%s4452_s14 + $0x140] sm:$0xff] }
0x12c6   :  { %1947 = vadd.xlane.f32.xlu0 %v1946_v26 }
0x134f   :  { %v1945_v33 = vpop.xlane.xlu0 %1944 }
0x1350   :  { %3678 = vrcp.f32 %v1945_v33 }
0x1353   :  { %v1948_v34 = vpop.xlane.xlu0 %1947 }
0x1354   :  { %3680 = vrcp.f32 %v1948_v34  ;;  %v2970_v34 = vld [vmem:[%s4450_s12 + $0x90] sm:$0xff] }
0x135a   :  { %v3679_v35 = vpop.eup %3678 }
0x135b   :  { %v1950_v36 = vmul.f32 %v3679_v35, %v3675_v28  ;;  %v2966_v28 = vld [vmem:[%s4450_s12 + $0x70] sm:$0xff]  ;;  %v2971_v35 = vld [vmem:[%s4450_s12 + $0x98] sm:$0xff] }
0x135d   :  { %3287 = vmatprep.mubr.msk.f32.mxu0 %vm397_vm7, %v1950_v36  ;;  %v3515_v36 = vpack.c.bf16 %v2971_v35, %v2970_v34  ;;  %v3006_v35 = vld [vmem:[%s4452_s14 + $0x170] sm:$0xff] }
0x135e   :  { %v3681_v38 = vpop.eup %3680 }
0x135f   :  { %v1952_v39 = vmul.f32 %v3681_v38, %v3677_v30  ;;  %v2967_v30 = vld [vmem:[%s4450_s12 + $0x78] sm:$0xff]  ;;  %v2972_v38 = vld [vmem:[%s4450_s12 + $0xa0] sm:$0xff] }
0x1360   :  { %v3507_v26 = vpack.c.bf16 %v2967_v30, %v2966_v28  ;;  %v3001_v28 = vld [vmem:[%s4452_s14 + $0x148] sm:$0xff]  ;;  %v3002_v30 = vld [vmem:[%s4452_s14 + $0x150] sm:$0xff] }
0x1361   :  { %3288 = vmatmul.mubr.msk.f32.vlgmr.msra.gmra.mrb[18].mxu0 %vm397_vm7, %v1952_v39  ;;  %v2973_v39 = vld [vmem:[%s4450_s12 + $0xa8] sm:$0xff] }
0x1362   :  { %3291 = vmatpush3.msra.mxu0 %v2939_v31  ;;  %v2969_v31 = vld [vmem:[%s4450_s12 + $0x88] sm:$0xff] }
0x1363   :  { %3295 = vmatprep.subr.mxu0 %v2938_v40 }
0x1434   :  { %v3289_v42 = vpop.f32.mrb[18].mxu0 }
0x1435   :  { %v2031_v16 = vpop.f32.mrb[19].mxu0 }
0x1436   :  { %3292 = vmatprep.mubr.msk.f32.mxu0 %vm311_vm5, %v2031_v16  ;;  %v2975_v16 = vld [vmem:[%s4450_s12 + $0xb8] sm:$0xff] }
0x1437   :  { %3293 = vmatmul.mubr.msk.f32.vlgmr.msra.gmra.mrb[20].mxu0 %vm311_vm5, %v3289_v42  ;;  %v2974_v42 = vld [vmem:[%s4450_s12 + $0xb0] sm:$0xff] }
0x1438   :  { %3296 = vmatpush3.msra.mxu0 %v2938_v40  ;;  %3297 = vmatprep.mubr.msk.f32.mxu0 %vm311_vm5, %v1831_v8  ;;  %v3519_v40 = vpack.c.bf16 %v2973_v39, %v2972_v38 }
0x143f   :  { %3298 = vmatmul.mubr.msk.f32.vlgmr.msra.gmra.mrb[20].mxu0 %vm311_vm5, %v3275_v7 }
0x1440   :  { %3311 = vmatprep.mubr.msk.f32.mxu0 %vm397_vm7, %v3989_v56 }
0x1512   :  { %v3299_v43 = vpop.f32.mrb[20].mxu0 }
0x1513   :  { %v2193_v44 = vpop.f32.mrb[21].mxu0  ;;  %v4242_v46 = vadd.f32 %v3299_v43, %v4158_v37  ;;  %v3523_v43 = vpack.c.bf16 %v2975_v16, %v2974_v42 }
0x1514   :  { %v4239_v45 = vadd.f32 %v2193_v44, %v4153_v32 }
0x1515   :  { %v2211_v14 = vsel %vm68_vm0, %v4242_v46, 0.0 }
0x1516   :  { %v2208_v47 = vsel %vm68_vm0, %v4239_v45, 0.0 }
0x1517   :  { %2209 = vadd.xlane.f32.xlu0 %v2208_v47 }
0x151b   :  { %2212 = vadd.xlane.f32.xlu0 %v2211_v14 }
0x15a4   :  { %v2210_v48 = vpop.xlane.xlu0 %2209 }
0x15a5   :  { %v2214_v49 = vmul.f32 0.03125, %v2210_v48 }
0x15a7   :  { %v2216_v50 = vsub.f32 %v4239_v45, %v2214_v49 }
0x15a8   :  { %v2213_v51 = vpop.xlane.xlu0 %2212 }
0x15a9   :  { %v2215_v52 = vmul.f32 0.03125, %v2213_v51  ;;  %v2218_v53 = vmul.f32 %v2216_v50, %v2216_v50  ;;  %v2248_v19 = vmul.f32 %v2958_v18, %v2216_v50 }
0x15ab   :  { %v2217_v32 = vsub.f32 %v4242_v46, %v2215_v52  ;;  %v2220_v37 = vsel %vm68_vm0, %v2218_v53, 0.0 }
0x15ac   :  { %2221 = vadd.xlane.f32.xlu0 %v2220_v37 }
0x15ad   :  { %v2219_v54 = vmul.f32 %v2217_v32, %v2217_v32  ;;  %v2249_v22 = vmul.f32 %v2958_v18, %v2217_v32  ;;  %v2992_v18 = vld [vmem:[%s4452_s14 + $0x100] sm:$0xff] }
0x15af   :  { %v2223_v58 = vsel %vm68_vm0, %v2219_v54, 0.0 }
0x15b0   :  { %2224 = vadd.xlane.f32.xlu0 %v2223_v58  ;;  %v2977_v58 = vld [vmem:[%s4451_s13 + $0x1] ss:$0 sm:$0xff] }
0x1639   :  { %v2222_v59 = vpop.xlane.xlu0 %2221 }
0x163a   :  { %v2226_v60 = vmul.f32 0.032258064, %v2222_v59 }
0x163c   :  { %3682 = vrsqrt.f32 %v2226_v60  ;;  %vm2230_vm3 = vcmp.eq.f32.partialorder %v2226_v60, inf  ;;  %v2233_v1 = vand.u32 2147483648, %v2226_v60  ;;  %vm2232_vm4 = vcmp.eq.f32.partialorder %v2226_v60, 0.0 }
0x163d   :  { %v2225_v61 = vpop.xlane.xlu0 %2224 }
0x163e   :  { %v2227_v62 = vmul.f32 0.032258064, %v2225_v61 }
0x1640   :  { %3684 = vrsqrt.f32 %v2227_v62  ;;  %vm2237_vm5 = vcmp.eq.f32.partialorder %v2227_v62, inf  ;;  %v2240_v8 = vand.u32 2147483648, %v2227_v62  ;;  %vm2239_vm6 = vcmp.eq.f32.partialorder %v2227_v62, 0.0 }
0x1646   :  { %v3683_v63 = vpop.eup %3682 }
0x1647   :  { %v2229_v0 = vmul.f32 %v3683_v63, %v2226_v60 }
0x1649   :  { %v2231_v2 = vsel %vm2230_vm3, %v2226_v60, %v2229_v0 }
0x164a   :  { %v3685_v3 = vpop.eup %3684  ;;  %v2234_v4 = vsel %vm2232_vm4, %v2233_v1, %v2231_v2  ;;  %v2984_v2 = vld [vmem:[%s4452_s14 + $0xc0] sm:$0xff] }
0x164b   :  { %v2236_v6 = vmul.f32 %v3685_v3, %v2227_v62  ;;  %v2250_v7 = vadd.f32 1e-06, %v2234_v4  ;;  %v2985_v3 = vld [vmem:[%s4452_s14 + $0xc8] sm:$0xff] }
0x164c   :  { %v3536_v4 = vpack.c.bf16 %v2985_v3, %v2984_v2 }
0x164d   :  { %v2238_v9 = vsel %vm2237_vm5, %v2227_v62, %v2236_v6  ;;  %3686 = vrcp.f32 %v2250_v7  ;;  %v2986_v6 = vld [vmem:[%s4452_s14 + $0xd0] sm:$0xff]  ;;  %v2987_v7 = vld [vmem:[%s4452_s14 + $0xd8] sm:$0xff] }
0x164e   :  { %v2241_v15 = vsel %vm2239_vm6, %v2240_v8, %v2238_v9  ;;  %v2989_v8 = vld [vmem:[%s4452_s14 + $0xe8] sm:$0xff] }
0x164f   :  { %v2251_v17 = vadd.f32 1e-06, %v2241_v15  ;;  %v2991_v15 = vld [vmem:[%s4452_s14 + $0xf8] sm:$0xff] }
0x1651   :  { %3688 = vrcp.f32 %v2251_v17 }
0x1657   :  { %v3687_v20 = vpop.eup %3686 }
0x1658   :  { %v2253_v21 = vmul.f32 %v3687_v20, %v2248_v19  ;;  %v2993_v19 = vld [vmem:[%s4452_s14 + $0x108] sm:$0xff] }
0x1659   :  { %v3548_v20 = vpack.c.bf16 %v2993_v19, %v2992_v18 }
0x165a   :  { %v2262_v23 = vadd.f32 %v2959_v5, %v2253_v21  ;;  %v2995_v21 = vld [vmem:[%s4452_s14 + $0x118] sm:$0xff] }
0x165b   :  { %v3689_v13 = vpop.eup %3688 }
0x165c   :  { %2416 = vrot.lane.b32.xlu1 %v2262_v23, %s3727_s19  ;;  %v2255_v24 = vmul.f32 %v3689_v13, %v2249_v22  ;;  %v2997_v13 = vld [vmem:[%s4452_s14 + $0x128] sm:$0xff] }
0x165e   :  { %v2263_v25 = vadd.f32 %v2959_v5, %v2255_v24  ;;  %v2994_v5 = vld [vmem:[%s4452_s14 + $0x110] sm:$0xff] }
0x165f   :  { %v3551_v22 = vpack.c.bf16 %v2995_v21, %v2994_v5 }
0x1660   :  { %2418 = vrot.lane.b32.xlu0 %v2263_v25, %s3727_s19  ;;  %v3495_v10 = vpack.c.bf16 %v2263_v25, %v2262_v23  ;;  %v2996_v23 = vld [vmem:[%s4452_s14 + $0x120] sm:$0xff]  ;;  %v2998_v25 = vld [vmem:[%s4452_s14 + $0x130] sm:$0xff]  ;;  %s2879_s19 = sshll.u32 %s3730_s23, 4  ;;  %s2880_s19 = int_to_ptr.vmem [resolvable:$true] %s2879_s19 }
0x1661   :  { %v3554_v24 = vpack.c.bf16 %v2997_v13, %v2996_v23  ;;  %p3703_p1 = scmp.lt.s32.totalorder %s2880_s19, %s2880_s19 }
0x1662   :  { %3496 = vmatprep.subr.bf16.mxu1 %v3495_v10  ;;  %3500 = vmatprep.subr.bf16.mxu0 %v3495_v10 }
0x1663   :  { %3498 = vmatpush3.bf16.msra.mxu1 %v3495_v10  ;;  %3502 = vmatpush3.bf16.msra.mxu0 %v3495_v10  ;;  %v2999_v10 = vld [vmem:[%s4452_s14 + $0x138] sm:$0xff] }
0x1664   :  { %3504 = vmatprep.subr.bf16.mxu1 %v3503_v29  ;;  %v3557_v12 = vpack.c.bf16 %v2999_v10, %v2998_v25 }
0x1666   :  { %3305 = vmatmul.mubr.msk.f32.vlgmr.msra.gmra.mrb[18].mxu1 %vm397_vm7, %v3984_v55  ;;  %3312 = vmatmul.mubr.msk.f32.vlgmr.msra.gmra.mrb[22].mxu0 %vm397_vm7, %v3998_v57 }
0x1667   :  { %3345 = vmatprep.mubr.msk.f32.mxu0 %vm397_vm7, %v3969_v27  ;;  %v2968_v27 = vld [vmem:[%s4450_s12 + $0x80] sm:$0xff]  ;;  %3506 = vmatpush3.bf16.msra.mxu1 %v3503_v29  ;;  %v3560_v29 = vpack.c.bf16 %v3001_v28, %v3000_v11 }
0x1668   :  { %3508 = vmatprep.subr.bf16.mxu1 %v3507_v26  ;;  %v3511_v33 = vpack.c.bf16 %v2969_v31, %v2968_v27  ;;  %v3004_v31 = vld [vmem:[%s4452_s14 + $0x160] sm:$0xff] }
0x166b   :  { %3510 = vmatpush3.bf16.msra.mxu1 %v3507_v26  ;;  %v3003_v26 = vld [vmem:[%s4452_s14 + $0x158] sm:$0xff] }
0x166c   :  { %3512 = vmatprep.subr.bf16.mxu1 %v3511_v33  ;;  %v3563_v27 = vpack.c.bf16 %v3003_v26, %v3002_v30 }
0x166f   :  { %3514 = vmatpush3.bf16.msra.mxu1 %v3511_v33  ;;  %v3005_v33 = vld [vmem:[%s4452_s14 + $0x168] sm:$0xff] }
0x1670   :  { %3516 = vmatprep.subr.bf16.mxu1 %v3515_v36  ;;  %v3566_v34 = vpack.c.bf16 %v3005_v33, %v3004_v31 }
0x1673   :  { %3518 = vmatpush3.bf16.msra.mxu1 %v3515_v36  ;;  %v3007_v36 = vld [vmem:[%s4452_s14 + $0x178] sm:$0xff] }
0x1674   :  { %3520 = vmatprep.subr.bf16.mxu1 %v3519_v40  ;;  %v3569_v38 = vpack.c.bf16 %v3007_v36, %v3006_v35 }
0x1677   :  { %3522 = vmatpush3.bf16.msra.mxu1 %v3519_v40 }
0x1678   :  { %3524 = vmatprep.subr.bf16.mxu1 %v3523_v43 }
0x167b   :  { %3526 = vmatpush3.bf16.msra.mxu1 %v3523_v43 }
0x16ce   :  { %v2417_v49 = vpop.permute.xlu1 %2416 }
0x16d2   :  { %v2419_v53 = vpop.permute.xlu0 %2418 }
0x1739   :  { %v3306_v44 = vpop.f32.mrb[18].mxu1  ;;  %v3313_v47 = vpop.f32.mrb[22].mxu0 }
0x173a   :  { %v2330_v14 = vpop.f32.mrb[19].mxu1  ;;  %v2405_v48 = vpop.f32.mrb[23].mxu0  ;;  %v2431_v32 = vsel %vm68_vm0, %v3306_v44, %v2419_v53 }
0x173b   :  { %2424 = vrot.lane.b32.xlu1 %v2405_v48, %s3728_s3  ;;  %v2430_v50 = vsel %vm68_vm0, %v2330_v14, %v2417_v49  ;;  %v3009_v14 = vld [vmem:[%s4453_s15 + $0x1] ss:$0 sm:$0xff] }
0x173f   :  { %2426 = vrot.lane.b32.xlu1 %v3313_v47, %s3728_s3 }
0x17ad   :  { %v2425_v51 = vpop.permute.xlu1 %2424 }
0x17ae   :  { %v2432_v52 = vsel %vm1109_vm12, %v2430_v50, %v2425_v51 }
0x17af   :  { %3338 = vmatprep.mubr.msk.f32.mxu1 %vm1131_vm13, %v2432_v52 }
0x17b1   :  { %v2427_v37 = vpop.permute.xlu1 %2426 }
0x17b2   :  { %v2433_v54 = vsel %vm1109_vm12, %v2431_v32, %v2427_v37 }
0x17b3   :  { %3339 = vmatmul.mubr.msk.f32.vlgmr.msra.gmra.mrb[20].mxu1 %vm1131_vm13, %v2433_v54 }
0x1886   :  { %v3340_v59 = vpop.f32.mrb[20].mxu1 }
0x1887   :  { %v2533_v60 = vadd.f32 %v3340_v59, %v2977_v58  ;;  %v2527_v61 = vpop.f32.mrb[21].mxu1 }
0x1888   :  { %v2528_v62 = vadd.f32 %v2977_v58, %v2527_v61 }
0x1889   :  { %v2537_v63 = vmax.f32 %v2533_v60, 0.0 }
0x188a   :  { %v2536_v0 = vmax.f32 %v2528_v62, 0.0 }
0x188c   :  { %v3527_v1 = vpack.c.bf16 %v2537_v63, %v2536_v0  ;;  %2690 = vrot.lane.b32.xlu1 %v2536_v0, %s3728_s3 }
0x188e   :  { %3528 = vmatprep.subr.bf16.mxu0 %v3527_v1 }
0x188f   :  { %3530 = vmatpush3.bf16.msra.mxu0 %v3527_v1 }
0x1890   :  { %2692 = vrot.lane.b32.xlu1 %v2537_v63, %s3728_s3  ;;  %3532 = vmatprep.subr.bf16.mxu0 %v3527_v1 }
0x1892   :  { %3346 = vmatmul.mubr.msk.f32.vlgmr.msra.gmra.mrb[24].mxu0 %vm397_vm7, %v3984_v55  ;;  %v3539_v55 = vpack.c.bf16 %v2987_v7, %v2986_v6 }
0x1893   :  { %3534 = vmatpush3.bf16.msra.mxu0 %v3527_v1  ;;  %3352 = vmatprep.mubr.msk.f32.mxu0 %vm397_vm7, %v3989_v56  ;;  %v2988_v56 = vld [vmem:[%s4452_s14 + $0xe0] sm:$0xff] }
0x1894   :  { %3535 = vmatprep.subr.bf16.mxu0 %v3729_v41  ;;  %v3542_v9 = vpack.c.bf16 %v2989_v8, %v2988_v56 }
0x1896   :  { %3353 = vmatmul.mubr.msk.f32.vlgmr.msra.gmra.mrb[26].mxu0 %vm397_vm7, %v3998_v57  ;;  %v2990_v57 = vld [vmem:[%s4452_s14 + $0xf0] sm:$0xff] }
0x1897   :  { %3537 = vmatpush1.bf16.msra.mxu0 %v3536_v4  ;;  %v3545_v17 = vpack.c.bf16 %v2991_v15, %v2990_v57 }
0x1898   :  { %3538 = vmatprep.subr.bf16.mxu0 %v3729_v41 }
0x189b   :  { %3540 = vmatpush1.bf16.msra.mxu0 %v3539_v55 }
0x189c   :  { %3541 = vmatprep.subr.bf16.mxu0 %v3729_v41 }
0x189f   :  { %3543 = vmatpush1.bf16.msra.mxu0 %v3542_v9 }
0x18a0   :  { %3544 = vmatprep.subr.bf16.mxu0 %v3729_v41 }
0x18a3   :  { %3546 = vmatpush1.bf16.msra.mxu0 %v3545_v17 }
0x18a4   :  { %3547 = vmatprep.subr.bf16.mxu0 %v3729_v41 }
0x18a7   :  { %3549 = vmatpush1.bf16.msra.mxu0 %v3548_v20 }
0x18a8   :  { %3550 = vmatprep.subr.bf16.mxu0 %v3729_v41 }
0x18ab   :  { %3552 = vmatpush1.bf16.msra.mxu0 %v3551_v22  ;;  %v3012_v22 = vld [vmem:[%s4454_s16] ss:$0 sm:$0xff]  ;;  %s3698_s16 = scalar_lea.vmem %s2880_s19, 256 }
0x18ac   :  { %3553 = vmatprep.subr.bf16.mxu0 %v3729_v41  ;;  %p3699_p0 = scmp.ne.s32.totalorder %s2880_s19, %s3698_s16  ;;  %p3704_p2 = scmp.lt.s32.totalorder %s3698_s16, %s3698_s16 }
0x18ae   :  { %p3705_p3 = por %p3704_p2, %p3703_p1 }
0x18af   :  { %3555 = vmatpush1.bf16.msra.mxu0 %v3554_v24  ;;  %v3013_v24 = vld [vmem:[%s4455_s17] ss:$0 sm:$0xff] }
0x18b0   :  { %3556 = vmatprep.subr.bf16.mxu0 %v3729_v41  ;;  %p3706_p4 = pnand %p3705_p3, %p3699_p0 }
0x18b3   :  { %3558 = vmatpush1.bf16.msra.mxu0 %v3557_v12 }
0x18b4   :  { %3559 = vmatprep.subr.bf16.mxu0 %v3729_v41 }
0x18b7   :  { %3561 = vmatpush1.bf16.msra.mxu0 %v3560_v29 }
0x18b8   :  { %3562 = vmatprep.subr.bf16.mxu0 %v3729_v41 }
0x18bb   :  { %3564 = vmatpush1.bf16.msra.mxu0 %v3563_v27 }
0x18bc   :  { %3565 = vmatprep.subr.bf16.mxu0 %v3729_v41 }
0x18bf   :  { %3567 = vmatpush1.bf16.msra.mxu0 %v3566_v34 }
0x18c0   :  { %3568 = vmatprep.subr.bf16.mxu0 %v3729_v41 }
0x18c3   :  { %3570 = vmatpush1.bf16.msra.mxu0 %v3569_v38 }
0x18fe   :  { %v2691_v42 = vpop.permute.xlu1 %2690 }
0x1902   :  { %v2693_v41 = vpop.permute.xlu1 %2692 }
0x1965   :  { %v3347_v39 = vpop.f32.mrb[24].mxu0 }
0x1966   :  { %v2604_v40 = vpop.f32.mrb[25].mxu0  ;;  %v2697_v47 = vsel %vm1109_vm12, %v3347_v39, %v2693_v41 }
0x1967   :  { %v2696_v44 = vsel %vm1109_vm12, %v2604_v40, %v2691_v42 }
0x1969   :  { %v3354_v16 = vpop.f32.mrb[26].mxu0 }
0x196a   :  { %v2679_v43 = vpop.f32.mrb[27].mxu0 }
0x196b   :  { %3010 = vmatprep.mubr.msk.f32.mxu0 %vm1109_vm12, %v2679_v43 }
0x196c   :  { %2802 = vmatmul.mubr.f32.vlgmr.msra.gmra.mrb[28].mxu0 %v2696_v44 }
0x196d   :  { %3011 = vmatprep.mubr.msk.f32.mxu0 %vm1109_vm12, %v3354_v16 }
0x1970   :  { %2807 = vmatmul.mubr.f32.gmra.mrb[30].mxu0 %v2697_v47 }
0x1a3f   :  { %v2803_v48 = vpop.f32.mrb[28].mxu0 }
0x1a40   :  { %v2804_v49 = vadd.f32 %v3009_v14, %v2803_v48  ;;  %v2805_v50 = vpop.f32.mrb[29].mxu0 }
0x1a42   :  { %v2812_v51 = vadd.f32 %v2804_v49, %v4239_v45 }
0x1a43   :  { %v2808_v52 = vpop.f32.mrb[30].mxu0 }
0x1a44   :  { %v2809_v53 = vadd.f32 %v3009_v14, %v2808_v52  ;;  %v2810_v32 = vpop.f32.mrb[31].mxu0  ;;  %v2816_v37 = vsel %vm68_vm0, %v2812_v51, 0.0 }
0x1a45   :  { %2817 = vadd.xlane.f32.xlu1 %v2816_v37 }
0x1a46   :  { %v2813_v54 = vadd.f32 %v2809_v53, %v4242_v46 }
0x1a48   :  { %v2819_v58 = vsel %vm68_vm0, %v2813_v54, 0.0 }
0x1a49   :  { %2820 = vadd.xlane.f32.xlu0 %v2819_v58 }
0x1ad2   :  { %v2818_v59 = vpop.xlane.xlu1 %2817 }
0x1ad3   :  { %v2822_v60 = vmul.f32 0.03125, %v2818_v59 }
0x1ad5   :  { %v2824_v61 = vsub.f32 %v2812_v51, %v2822_v60 }
0x1ad6   :  { %v2821_v62 = vpop.xlane.xlu0 %2820 }
0x1ad7   :  { %v2823_v63 = vmul.f32 0.03125, %v2821_v62  ;;  %v2826_v0 = vmul.f32 %v2824_v61, %v2824_v61  ;;  %v2856_v23 = vmul.f32 %v3012_v22, %v2824_v61 }
0x1ad9   :  { %v2825_v1 = vsub.f32 %v2813_v54, %v2823_v63  ;;  %v2828_v45 = vsel %vm68_vm0, %v2826_v0, 0.0 }
0x1ada   :  { %2829 = vadd.xlane.f32.xlu0 %v2828_v45 }
0x1adb   :  { %v2827_v2 = vmul.f32 %v2825_v1, %v2825_v1  ;;  %v2857_v10 = vmul.f32 %v3012_v22, %v2825_v1 }
0x1add   :  { %v2831_v3 = vsel %vm68_vm0, %v2827_v2, 0.0 }
0x1ade   :  { %2832 = vadd.xlane.f32.xlu1 %v2831_v3 }
0x1b67   :  { %v2830_v4 = vpop.xlane.xlu0 %2829 }
0x1b68   :  { %v2834_v6 = vmul.f32 0.032258064, %v2830_v4 }
0x1b6a   :  { %3690 = vrsqrt.f32 %v2834_v6  ;;  %vm2838_vm7 = vcmp.eq.f32.partialorder %v2834_v6, inf  ;;  %v2841_v8 = vand.u32 2147483648, %v2834_v6  ;;  %vm2840_vm8 = vcmp.eq.f32.partialorder %v2834_v6, 0.0 }
0x1b6b   :  { %v2833_v46 = vpop.xlane.xlu1 %2832 }
0x1b6c   :  { %v2835_v7 = vmul.f32 0.032258064, %v2833_v46 }
0x1b6e   :  { %3692 = vrsqrt.f32 %v2835_v7  ;;  %vm2845_vm9 = vcmp.eq.f32.partialorder %v2835_v7, inf  ;;  %v2848_v19 = vand.u32 2147483648, %v2835_v7  ;;  %vm2847_vm10 = vcmp.eq.f32.partialorder %v2835_v7, 0.0 }
0x1b74   :  { %v3691_v55 = vpop.eup %3690 }
0x1b75   :  { %v2837_v56 = vmul.f32 %v3691_v55, %v2834_v6 }
0x1b77   :  { %v2839_v9 = vsel %vm2838_vm7, %v2834_v6, %v2837_v56 }
0x1b78   :  { %v3693_v57 = vpop.eup %3692  ;;  %v2842_v15 = vsel %vm2840_vm8, %v2841_v8, %v2839_v9 }
0x1b79   :  { %v2858_v17 = vadd.f32 1e-06, %v2842_v15  ;;  %v2844_v18 = vmul.f32 %v3693_v57, %v2835_v7 }
0x1b7b   :  { %3694 = vrcp.f32 %v2858_v17  ;;  %v2846_v20 = vsel %vm2845_vm9, %v2835_v7, %v2844_v18 }
0x1b7c   :  { %v2849_v5 = vsel %vm2847_vm10, %v2848_v19, %v2846_v20 }
0x1b7d   :  { %v2859_v21 = vadd.f32 1e-06, %v2849_v5 }
0x1b7f   :  { %3696 = vrcp.f32 %v2859_v21 }
0x1b85   :  { %v3695_v13 = vpop.eup %3694 }
0x1b86   :  { %v2861_v25 = vmul.f32 %v3695_v13, %v2856_v23 }
0x1b88   :  { %v2870_v12 = vadd.f32 %v3013_v24, %v2861_v25 }
0x1b89   :  { %v3697_v11 = vpop.eup %3696 }
0x1b8a   :  { %v2863_v28 = vmul.f32 %v3697_v11, %v2857_v10  ;;  %2872 = vst.msk [vmem:[#allocation2] sm:$0xff] %vm68_vm0, %v2870_v12 }
0x1b8c   :  { %v2871_v29 = vadd.f32 %v3013_v24, %v2863_v28 }
0x1b8e   :  { %2873 = vst.msk [vmem:[#allocation2 + $0x8] sm:$0xff] %vm68_vm0, %v2871_v29 }
0x1b8f   :  { %3709 = shalt.err (!%p3706_p4)
}
0x1b90   :  { %s3710_s13 = scalar_lea.hbm %s4456_s18, 256 }
0x1b91   :  { %p3711_p5 = scmp.ne.s32.totalorder %s4456_s18, %s3710_s13  ;;  %p3714_p6 = scmp.lt.u32.totalorder %s3710_s13, %s4456_s18 }
0x1b93   :  { %p3716_p7 = pnand %p3714_p6, %p3711_p5 }
0x1b95   :  { %3719 = shalt.err (!%p3716_p7)
}
0x1b96   :  { %s3731_s30 = smov 128   ;;  %s3732_s0 = smov 8  }
0x1b97   :  { %2885 = dma.vmem_to_hbm [thread:$0]  %s2880_s19, 256, %s4456_s18, [#allocation3], %s3731_s30, %s3731_s30, %s3732_s0  }
0x1b98   :  { %3720 = dma.done.wait [#allocation3], 256  }
0x1b99   :  { %3721 = vsyncadd [#allocation3], 4294967040 }
0x1b9a   :  { %2889 = vsyncpa [#allocation3], 1 }

</bundles_post_ra>
